<compile_context>
chip_gen: v7x
topology: tpu7x:2x2x1
jax: 0.10.0
libtpu: 0.0.40
codegen_flags: <defaults>
</compile_context>

<pallas_src>
import jax
import jax.numpy as jnp
from jax import lax
from jax.experimental import pallas as pl
from jax.experimental.pallas import tpu as pltpu


_LANE = 128
_SUBLANE = 8


def _round_up(n, m):
    return ((n + m - 1) // m) * m


def _vmem_tile_bytes(rows, cols, itemsize):
    """VMEM footprint of one (rows, cols) slab after hardware tile padding."""
    sublane = _SUBLANE * (4 // itemsize)          # f32 -> 8 rows, bf16 -> 16 rows
    return _round_up(max(rows, 1), sublane) * _round_up(max(cols, 1), _LANE) * itemsize


def _vmem_config():
    """Generation-aware (tile_budget_bytes, vmem_limit_bytes, want_even_grid)."""
    vmem = None
    try:
        vmem = getattr(pltpu.get_tpu_info(), "vmem_capacity_bytes", None)
    except Exception:
        vmem = None
    if vmem is None:
        vmem = 64 * 1024 * 1024                   # conservative default: v7x per-TC size
    if vmem >= 100 * 1024 * 1024:                 # v5e / v6e: 128 MiB VMEM, 1 TensorCore
        return 48 * 1024 * 1024, 100 * 1024 * 1024, False
    # v7x: 64 MiB per TC, 2 TCs -> modest tiles, even grid so both TCs get work.
    return 20 * 1024 * 1024, 48 * 1024 * 1024, True


def _choose_tiling(m_total, per_mode_vmem, budget_bytes, want_even_grid):
    """Pick (tm, grid) with tm*grid >= m_total; tm capped by double-buffered VMEM."""
    cap = max(1, budget_bytes // (2 * per_mode_vmem))
    tm = min(cap, m_total)
    grid = pl.cdiv(m_total, tm)
    if want_even_grid and m_total > 1:
        if grid < 2:
            tm = pl.cdiv(m_total, 2)
            grid = 2
        elif grid % 2 == 1:
            grid += 1
    return tm, grid


def _spectral_mix_kernel(a_ref, w_ref, o_ref):
    # a_ref: (2, TM, Bp, Cip) bf16   [0] = real, [1] = imag
    # w_ref: (2, TM, Cip, Cop) bf16
    # o_ref: (2, TM, Bp, Cop) f32
    dn = (((2,), (1,)), ((0,), (0,)))             # batched over the mode axis
    ar, ai = a_ref[0], a_ref[1]
    wr, wi = w_ref[0], w_ref[1]
    rr = lax.dot_general(ar, wr, dn, preferred_element_type=jnp.float32)
    ii = lax.dot_general(ai, wi, dn, preferred_element_type=jnp.float32)
    ri = lax.dot_general(ar, wi, dn, preferred_element_type=jnp.float32)
    ir = lax.dot_general(ai, wr, dn, preferred_element_type=jnp.float32)
    o_ref[0] = rr - ii
    o_ref[1] = ri + ir


def spectral_mix_pallas(a_ri, w_ri, tm, grid, vmem_limit):
    """Per-mode complex channel mix on the MXU.

    a_ri: (2, Mp, Bp, Cip) bf16, w_ri: (2, Mp, Cip, Cop) bf16
      -> (2, Mp, Bp, Cop) f32  ([0]=real, [1]=imag)
    """
    _, mp, bp, cip = a_ri.shape
    cop = w_ri.shape[-1]
    return pl.pallas_call(
        _spectral_mix_kernel,
        out_shape=jax.ShapeDtypeStruct((2, mp, bp, cop), jnp.float32),
        grid=(grid,),
        in_specs=[pl.BlockSpec((2, tm, bp, cip), lambda m: (0, m, 0, 0)),
                  pl.BlockSpec((2, tm, cip, cop), lambda m: (0, m, 0, 0))],
        out_specs=pl.BlockSpec((2, tm, bp, cop), lambda m: (0, m, 0, 0)),
        compiler_params=pltpu.CompilerParams(
            dimension_semantics=("parallel",),
            vmem_limit_bytes=vmem_limit),
    )(a_ri, w_ri)


class SpectralConv2d:
    """JAX/Pallas port of the PyTorch SpectralConv2d module (forward only)."""

    def __init__(self, in_channels, out_channels, modes1, modes2, key):
        self.in_channels = in_channels
        self.out_channels = out_channels
        self.modes1 = modes1
        self.modes2 = modes2
        scale = 1.0 / (in_channels * out_channels)
        shape = (in_channels, out_channels, modes1, modes2)
        k1, k2, k3, k4 = jax.random.split(key, 4)
        # torch.rand(..., dtype=cfloat): real & imag each uniform [0,1)
        self.weights1 = (scale * (jax.random.uniform(k1, shape) +
                                  1j * jax.random.uniform(k2, shape))).astype(jnp.complex64)
        self.weights2 = (scale * (jax.random.uniform(k3, shape) +
                                  1j * jax.random.uniform(k4, shape))).astype(jnp.complex64)

        # ---- precompute mode-major, split real/imag, bf16 weights (once) ----
        # Shape (2, M, Cip, Cop): [0]=real, [1]=imag; weights1 modes then weights2.
        ci, co, m1, m2 = in_channels, out_channels, modes1, modes2
        self._ci_p = _round_up(ci, _SUBLANE)
        self._co_p = _round_up(co, _SUBLANE)
        m_total = 2 * m1 * m2
        w_cat = jnp.concatenate([self.weights1, self.weights2], axis=2)   # (Ci,Co,2m1,m2)
        w_mm = w_cat.reshape(ci, co, m_total).transpose(2, 0, 1)          # (M, Ci, Co)
        w_ri = jnp.stack([w_mm.real, w_mm.imag], axis=0)                  # (2, M, Ci, Co)
        w_ri = jnp.pad(w_ri, ((0, 0), (0, 0),
                              (0, self._ci_p - ci), (0, self._co_p - co)))
        self._w_ri = w_ri.astype(jnp.bfloat16)

    def __call__(self, x):
        B, _, H, W = x.shape
        m1, m2 = self.modes1, self.modes2
        ci, co = self.in_channels, self.out_channels
        cip, cop = self._ci_p, self._co_p
        wr_len = W // 2 + 1
        m_total = 2 * m1 * m2

        # TODO(synk): rfft2/irfft2 have no Pallas TPU equivalent; computed in plain JAX.
        x_ft = jnp.fft.rfft2(x)                                           # (B, Ci, H, Wr)

        # Both retained mode slabs -> mode-major activations (2, M, B, Ci) bf16.
        x_modes = jnp.concatenate(
            [x_ft[:, :, :m1, :m2], x_ft[:, :, H - m1:, :m2]], axis=2)     # (B,Ci,2m1,m2)
        a_mm = x_modes.reshape(B, ci, m_total).transpose(2, 0, 1)         # (M, B, Ci)
        a_ri = jnp.stack([a_mm.real, a_mm.imag], axis=0).astype(jnp.bfloat16)

        # Tiling: batch to bf16 sublane tile, mode count to tm*grid
        # (generation-aware VMEM budget; even >=2-step grid on v7x).
        bp = _round_up(B, 2 * _SUBLANE)
        tile_budget, vmem_limit, want_even = _vmem_config()
        per_mode = (2 * _vmem_tile_bytes(bp, cip, 2) +
                    2 * _vmem_tile_bytes(cip, cop, 2) +
                    2 * _vmem_tile_bytes(bp, cop, 4))
        tm, grid = _choose_tiling(m_total, per_mode, tile_budget, want_even)
        mp = tm * grid

        a_ri = jnp.pad(a_ri, ((0, 0), (0, mp - m_total),
                              (0, bp - B), (0, cip - ci)))
        w_ri = self._w_ri
        if mp > m_total:
            w_ri = jnp.pad(w_ri, ((0, 0), (0, mp - m_total), (0, 0), (0, 0)))

        out = spectral_mix_pallas(a_ri, w_ri, tm, grid, vmem_limit)       # (2,Mp,Bp,Cop)

        out_c = (out[0, :m_total, :B, :co]
                 + 1j * out[1, :m_total, :B, :co]).astype(jnp.complex64)  # (M, B, Co)
        out_c = out_c.reshape(2 * m1, m2, B, co).transpose(2, 3, 0, 1)    # (B,Co,2m1,m2)
        top, bot = out_c[:, :, :m1, :], out_c[:, :, m1:, :]

        # Assemble out_ft with pad/concatenate (no zeros + scatter copies).
        if H >= 2 * m1:
            top_p = jnp.pad(top, ((0, 0), (0, 0), (0, 0), (0, wr_len - m2)))
            bot_p = jnp.pad(bot, ((0, 0), (0, 0), (0, 0), (0, wr_len - m2)))
            mid = jnp.zeros((B, co, H - 2 * m1, wr_len), dtype=jnp.complex64)
            out_ft = jnp.concatenate([top_p, mid, bot_p], axis=2)
        else:  # overlapping mode slabs: fall back to the scatter form
            out_ft = jnp.zeros((B, co, H, wr_len), dtype=jnp.complex64)
            out_ft = out_ft.at[:, :, :m1, :m2].set(top)
            out_ft = out_ft.at[:, :, H - m1:, :m2].set(bot)

        return jnp.fft.irfft2(out_ft, s=(H, W))                           # (B, Co, H, W)


def _reference_forward(x, layer):
    """Pure-JAX reference (mirrors the PyTorch forward) for validation."""
    B, _, H, W = x.shape
    x_ft = jnp.fft.rfft2(x)
    m1, m2 = layer.modes1, layer.modes2
    top = jnp.einsum('bixy,ioxy->boxy', x_ft[:, :, :m1, :m2], layer.weights1)
    bot = jnp.einsum('bixy,ioxy->boxy', x_ft[:, :, -m1:, :m2], layer.weights2)
    out_ft = jnp.zeros((B, layer.out_channels, H, W // 2 + 1), dtype=jnp.complex64)
    out_ft = out_ft.at[:, :, :m1, :m2].set(top)
    out_ft = out_ft.at[:, :, -m1:, :m2].set(bot)
    return jnp.fft.irfft2(out_ft, s=(H, W))


if __name__ == "__main__":
    key = jax.random.PRNGKey(0)
    k_x, k_w = jax.random.split(key)

    batch, in_ch, out_ch, H, W = 2, 4, 4, 16, 16
    modes1, modes2 = 4, 4

    x = jax.random.normal(k_x, (batch, in_ch, H, W), dtype=jnp.float32)
    layer = SpectralConv2d(in_ch, out_ch, modes1, modes2, k_w)

    y = jax.block_until_ready(layer(x))
    y_ref = jax.block_until_ready(_reference_forward(x, layer))

    assert y.shape == (batch, out_ch, H, W)
    # bf16 streaming with f32 MXU accumulation: validate with a relative L2 tolerance.
    rel_err = float(jnp.linalg.norm(y - y_ref) / (jnp.linalg.norm(y_ref) + 1e-12))
    assert rel_err < 3e-2, f"Pallas output mismatch vs reference (rel_err={rel_err})"

    print("KERNEL_OK")
</pallas_src>

<mosaic_0001>
module attributes {stable_mosaic.version = 11 : i64} {
  func.func @_spectral_mix_kernel(%arg0: i32, %arg1: memref<2x16x16x8xbf16, #tpu.memory_space<vmem>>, %arg2: memref<2x16x8x8xbf16, #tpu.memory_space<vmem>>, %arg3: memref<2x16x16x8xf32, #tpu.memory_space<vmem>>) attributes {dimension_semantics = [#tpu.dimension_semantics<parallel>], iteration_bounds = array<i64: 2>, scalar_prefetch = 0 : i64, scratch_operands = 0 : i64, tpu.core_type = #tpu.core_type<tc>, window_params = [{transform_indices = @transform_0, window_bounds = array<i64: 2, 16, 16, 8>}, {transform_indices = @transform_1, window_bounds = array<i64: 2, 16, 8, 8>}, {transform_indices = @transform_2, window_bounds = array<i64: 2, 16, 16, 8>}]} {
    %c0 = arith.constant 0 : index
    %c0_0 = arith.constant 0 : index
    %c0_1 = arith.constant 0 : index
    %c0_2 = arith.constant 0 : index
    %0 = vector.load %arg1[%c0, %c0_0, %c0_1, %c0_2] : memref<2x16x16x8xbf16, #tpu.memory_space<vmem>>, vector<1x16x16x8xbf16>
    %1 = vector.shape_cast %0 : vector<1x16x16x8xbf16> to vector<16x16x8xbf16>
    %c1 = arith.constant 1 : index
    %c0_3 = arith.constant 0 : index
    %c0_4 = arith.constant 0 : index
    %c0_5 = arith.constant 0 : index
    %2 = vector.load %arg1[%c1, %c0_3, %c0_4, %c0_5] : memref<2x16x16x8xbf16, #tpu.memory_space<vmem>>, vector<1x16x16x8xbf16>
    %3 = vector.shape_cast %2 : vector<1x16x16x8xbf16> to vector<16x16x8xbf16>
    %c0_6 = arith.constant 0 : index
    %c0_7 = arith.constant 0 : index
    %c0_8 = arith.constant 0 : index
    %c0_9 = arith.constant 0 : index
    %4 = vector.load %arg2[%c0_6, %c0_7, %c0_8, %c0_9] : memref<2x16x8x8xbf16, #tpu.memory_space<vmem>>, vector<1x16x8x8xbf16>
    %5 = vector.shape_cast %4 : vector<1x16x8x8xbf16> to vector<16x8x8xbf16>
    %c1_10 = arith.constant 1 : index
    %c0_11 = arith.constant 0 : index
    %c0_12 = arith.constant 0 : index
    %c0_13 = arith.constant 0 : index
    %6 = vector.load %arg2[%c1_10, %c0_11, %c0_12, %c0_13] : memref<2x16x8x8xbf16, #tpu.memory_space<vmem>>, vector<1x16x8x8xbf16>
    %7 = vector.shape_cast %6 : vector<1x16x8x8xbf16> to vector<16x8x8xbf16>
    %cst = arith.constant dense<0.000000e+00> : vector<16x16x8xf32>
    %8 = tpu.matmul %1, %5, %cst {dimension_numbers = #tpu.dot_dimension_numbers<[2], [1], [1], [2], [0, 0, 0, 1, 1, 2], [0], [0]>} : vector<16x16x8xbf16>, vector<16x8x8xbf16>, vector<16x16x8xf32> -> vector<16x16x8xf32>
    %cst_14 = arith.constant dense<0.000000e+00> : vector<16x16x8xf32>
    %9 = tpu.matmul %3, %7, %cst_14 {dimension_numbers = #tpu.dot_dimension_numbers<[2], [1], [1], [2], [0, 0, 0, 1, 1, 2], [0], [0]>} : vector<16x16x8xbf16>, vector<16x8x8xbf16>, vector<16x16x8xf32> -> vector<16x16x8xf32>
    %cst_15 = arith.constant dense<0.000000e+00> : vector<16x16x8xf32>
    %10 = tpu.matmul %1, %7, %cst_15 {dimension_numbers = #tpu.dot_dimension_numbers<[2], [1], [1], [2], [0, 0, 0, 1, 1, 2], [0], [0]>} : vector<16x16x8xbf16>, vector<16x8x8xbf16>, vector<16x16x8xf32> -> vector<16x16x8xf32>
    %cst_16 = arith.constant dense<0.000000e+00> : vector<16x16x8xf32>
    %11 = tpu.matmul %3, %5, %cst_16 {dimension_numbers = #tpu.dot_dimension_numbers<[2], [1], [1], [2], [0, 0, 0, 1, 1, 2], [0], [0]>} : vector<16x16x8xbf16>, vector<16x8x8xbf16>, vector<16x16x8xf32> -> vector<16x16x8xf32>
    %12 = arith.subf %8, %9 : vector<16x16x8xf32>
    %c0_17 = arith.constant 0 : index
    %c0_18 = arith.constant 0 : index
    %c0_19 = arith.constant 0 : index
    %c0_20 = arith.constant 0 : index
    %13 = vector.load %arg3[%c0_17, %c0_18, %c0_19, %c0_20] : memref<2x16x16x8xf32, #tpu.memory_space<vmem>>, vector<1x16x16x8xf32>
    %14 = vector.shape_cast %13 : vector<1x16x16x8xf32> to vector<16x16x8xf32>
    %15 = vector.shape_cast %12 : vector<16x16x8xf32> to vector<1x16x16x8xf32>
    tpu.vector_store %arg3[%c0_17, %c0_18, %c0_19, %c0_20], %15 {strides = array<i32>} : memref<2x16x16x8xf32, #tpu.memory_space<vmem>>, vector<1x16x16x8xf32>,
    %16 = arith.addf %10, %11 : vector<16x16x8xf32>
    %c1_21 = arith.constant 1 : index
    %c0_22 = arith.constant 0 : index
    %c0_23 = arith.constant 0 : index
    %c0_24 = arith.constant 0 : index
    %17 = vector.load %arg3[%c1_21, %c0_22, %c0_23, %c0_24] : memref<2x16x16x8xf32, #tpu.memory_space<vmem>>, vector<1x16x16x8xf32>
    %18 = vector.shape_cast %17 : vector<1x16x16x8xf32> to vector<16x16x8xf32>
    %19 = vector.shape_cast %16 : vector<16x16x8xf32> to vector<1x16x16x8xf32>
    tpu.vector_store %arg3[%c1_21, %c0_22, %c0_23, %c0_24], %19 {strides = array<i32>} : memref<2x16x16x8xf32, #tpu.memory_space<vmem>>, vector<1x16x16x8xf32>,
    return
  }
  func.func @transform_0(%arg0: i32) -> (i32, i32, i32, i32) {
    %c0_i32 = arith.constant 0 : i32
    %c0_i32_0 = arith.constant 0 : i32
    %c0_i32_1 = arith.constant 0 : i32
    %c0_i32_2 = arith.constant 0 : i32
    return %c0_i32, %arg0, %c0_i32_0, %c0_i32_1 : i32, i32, i32, i32
  }
  func.func @transform_1(%arg0: i32) -> (i32, i32, i32, i32) {
    %c0_i32 = arith.constant 0 : i32
    %c0_i32_0 = arith.constant 0 : i32
    %c0_i32_1 = arith.constant 0 : i32
    %c0_i32_2 = arith.constant 0 : i32
    return %c0_i32, %arg0, %c0_i32_0, %c0_i32_1 : i32, i32, i32, i32
  }
  func.func @transform_2(%arg0: i32) -> (i32, i32, i32, i32) {
    %c0_i32 = arith.constant 0 : i32
    %c0_i32_0 = arith.constant 0 : i32
    %c0_i32_1 = arith.constant 0 : i32
    %c0_i32_2 = arith.constant 0 : i32
    return %c0_i32, %arg0, %c0_i32_0, %c0_i32_1 : i32, i32, i32, i32
  }
}

</mosaic_0001>

<bundles_post_ra>
// kernel: tpu_custom_call.1
= control target key start
LH: loop header
LB: loop body
LE: loop exit
PB: predicated region body
PF: predicated region fallthrough
CT: control target
= control target key end

     0   :  { %s5042_s9 = smov 0   ;;  %s5044_s10 = smov 0   ;;  %s6174_s0 = inlined_call_operand.vmem [shape: bf16[2,32,16,8], index: 0, kind: input, shape index: {}]   ;;  %s6175_s1 = inlined_call_operand.vmem [shape: bf16[2,32,8,8], index: 1, kind: input, shape index: {}]   ;;  %s6176_s2 = inlined_call_operand.vmem [shape: f32[2,32,16,8], index: 2, kind: output, shape index: {}]  }
   0x1   :  { %s5046_s11 = smov 0  }
   0x2 LB: > { %s4165_s12 = sadd.s32 4294967295, %s5023_s11   ;;  %s5059_s13 = sadd.s32 1, %s5023_s11   ;;  %s5023_s11 = sphi %s5046_s11, %s6184_s11   ;;  %s5019_s10 = sphi %s5044_s10, %s6183_s10   ;;  %s5015_s9 = sphi %s5042_s9, %s6182_s9  }
   0x3   : > { %s16_s14 = ssub.s32 %s5023_s11, %s5059_s13  ;;  %s19_s15 = sadd.s32 1, %s5019_s10 }
   0x4   : > { %p17_p0 = scmp.eq.s32.totalorder %s16_s14, 0  ;;  %p26_p1 = scmp.ne.s32.totalorder %s5019_s10, %s5015_s9 }
   0x5   : > { %p27_p2 = scmp.eq.s32.totalorder %s5023_s11, 0  ;;  %p82_p3 = scmp.eq.s32.totalorder %s4165_s12, 1 }
   0x6   : > { %s5070_s16 = scalar_select %p17_p0, %s5019_s10, %s19_s15  }
   0x7   : > { %p5072_p4 = por %p27_p2, %p26_p1  ;;  %p5076_p5 = por %p82_p3, %p26_p1 }
   0x8   : > { %p4168_p6 = scmp.ge.s32.totalorder %s5023_s11, 2 }
   0xa   : > { %104 = sbr.rel (%p4168_p6) target bundleno = 49 (0x31), region = 16 }
  0x11   : > { %107 = sbr.rel (!%p5072_p4) target bundleno = 37 (0x25), region = 20  ;;  %s109_s19 = sand.u32 (%p5072_p4), 1, %s5019_s10  }
  0x12   : > { %s4363_s20 = sshll.u32 (%p5072_p4), %s5023_s11, 7  ;;  %s4169_s21 = sshll.u32 (%p5072_p4), %s109_s19, 8 }
  0x13   : > { %s5088_s24 = scalar_lea.vmem (%p5072_p4), %s6174_s0, %s4363_s20  ;;  %s5093_s25 = scalar_lea.vmem (%p5072_p4), [#allocation2], %s4169_s21 }
  0x14   : > { %v131_v0 = vld [vmem:[%s5088_s24] sm:$0xff] (%p5072_p4)   ;;  %v135_v1 = vld [vmem:[%s5088_s24 + $0x8] sm:$0xff] (%p5072_p4)   ;;  %v139_v2 = vld [vmem:[%s5088_s24 + $0x10] sm:$0xff] (%p5072_p4)  }
  0x15   : > { %132 = vst [vmem:[%s5093_s25] sm:$0xff] (%p5072_p4), %v131_v0   ;;  %136 = vst [vmem:[%s5093_s25 + $0x8] sm:$0xff] (%p5072_p4), %v135_v1   ;;  %v143_v3 = vld [vmem:[%s5088_s24 + $0x18] sm:$0xff] (%p5072_p4)   ;;  %v147_v4 = vld [vmem:[%s5088_s24 + $0x20] sm:$0xff] (%p5072_p4)  }
  0x16   : > { %140 = vst [vmem:[%s5093_s25 + $0x10] sm:$0xff] (%p5072_p4), %v139_v2   ;;  %v151_v5 = vld [vmem:[%s5088_s24 + $0x28] sm:$0xff] (%p5072_p4)   ;;  %144 = vst [vmem:[%s5093_s25 + $0x18] sm:$0xff] (%p5072_p4), %v143_v3   ;;  %v155_v6 = vld [vmem:[%s5088_s24 + $0x30] sm:$0xff] (%p5072_p4)  }
  0x17   : > { %148 = vst [vmem:[%s5093_s25 + $0x20] sm:$0xff] (%p5072_p4), %v147_v4   ;;  %152 = vst [vmem:[%s5093_s25 + $0x28] sm:$0xff] (%p5072_p4), %v151_v5   ;;  %v159_v7 = vld [vmem:[%s5088_s24 + $0x38] sm:$0xff] (%p5072_p4)   ;;  %v163_v8 = vld [vmem:[%s5088_s24 + $0x40] sm:$0xff] (%p5072_p4)  }
  0x18   : > { %156 = vst [vmem:[%s5093_s25 + $0x30] sm:$0xff] %v155_v6   ;;  %160 = vst [vmem:[%s5093_s25 + $0x38] sm:$0xff] %v159_v7   ;;  %v167_v9 = vld [vmem:[%s5088_s24 + $0x48] sm:$0xff]   ;;  %v171_v10 = vld [vmem:[%s5088_s24 + $0x50] sm:$0xff]  }
  0x19   : > { %164 = vst [vmem:[%s5093_s25 + $0x40] sm:$0xff] %v163_v8   ;;  %v175_v11 = vld [vmem:[%s5088_s24 + $0x58] sm:$0xff]   ;;  %168 = vst [vmem:[%s5093_s25 + $0x48] sm:$0xff] %v167_v9   ;;  %v179_v12 = vld [vmem:[%s5088_s24 + $0x60] sm:$0xff]  }
  0x1a   : > { %172 = vst [vmem:[%s5093_s25 + $0x50] sm:$0xff] %v171_v10   ;;  %176 = vst [vmem:[%s5093_s25 + $0x58] sm:$0xff] %v175_v11   ;;  %v183_v13 = vld [vmem:[%s5088_s24 + $0x68] sm:$0xff]   ;;  %v187_v14 = vld [vmem:[%s5088_s24 + $0x70] sm:$0xff]  }
  0x1b   : > { %180 = vst [vmem:[%s5093_s25 + $0x60] sm:$0xff] %v179_v12   ;;  %184 = vst [vmem:[%s5093_s25 + $0x68] sm:$0xff] %v183_v13   ;;  %v191_v15 = vld [vmem:[%s5088_s24 + $0x78] sm:$0xff]   ;;  %v195_v16 = vld [vmem:[%s5088_s24 + $0x100] sm:$0xff]  }
  0x1c   : > { %188 = vst [vmem:[%s5093_s25 + $0x70] sm:$0xff] %v187_v14   ;;  %v199_v17 = vld [vmem:[%s5088_s24 + $0x108] sm:$0xff]   ;;  %192 = vst [vmem:[%s5093_s25 + $0x78] sm:$0xff] %v191_v15   ;;  %v203_v18 = vld [vmem:[%s5088_s24 + $0x110] sm:$0xff]  }
  0x1d   : > { %196 = vst [vmem:[%s5093_s25 + $0x80] sm:$0xff] %v195_v16   ;;  %200 = vst [vmem:[%s5093_s25 + $0x88] sm:$0xff] %v199_v17   ;;  %v207_v19 = vld [vmem:[%s5088_s24 + $0x118] sm:$0xff]   ;;  %v211_v20 = vld [vmem:[%s5088_s24 + $0x120] sm:$0xff]  }
  0x1e   : > { %204 = vst [vmem:[%s5093_s25 + $0x90] sm:$0xff] %v203_v18   ;;  %208 = vst [vmem:[%s5093_s25 + $0x98] sm:$0xff] %v207_v19   ;;  %v215_v21 = vld [vmem:[%s5088_s24 + $0x128] sm:$0xff]   ;;  %v219_v22 = vld [vmem:[%s5088_s24 + $0x130] sm:$0xff]  }
  0x1f   : > { %212 = vst [vmem:[%s5093_s25 + $0xa0] sm:$0xff] %v211_v20   ;;  %v223_v23 = vld [vmem:[%s5088_s24 + $0x138] sm:$0xff]   ;;  %216 = vst [vmem:[%s5093_s25 + $0xa8] sm:$0xff] %v215_v21   ;;  %v227_v24 = vld [vmem:[%s5088_s24 + $0x140] sm:$0xff]  }
  0x20   : > { %220 = vst [vmem:[%s5093_s25 + $0xb0] sm:$0xff] %v219_v22   ;;  %224 = vst [vmem:[%s5093_s25 + $0xb8] sm:$0xff] %v223_v23   ;;  %v231_v25 = vld [vmem:[%s5088_s24 + $0x148] sm:$0xff]   ;;  %v235_v26 = vld [vmem:[%s5088_s24 + $0x150] sm:$0xff]  }
  0x21   : > { %228 = vst [vmem:[%s5093_s25 + $0xc0] sm:$0xff] %v227_v24   ;;  %232 = vst [vmem:[%s5093_s25 + $0xc8] sm:$0xff] %v231_v25   ;;  %v239_v27 = vld [vmem:[%s5088_s24 + $0x158] sm:$0xff]   ;;  %v243_v28 = vld [vmem:[%s5088_s24 + $0x160] sm:$0xff]  }
  0x22   : > { %236 = vst [vmem:[%s5093_s25 + $0xd0] sm:$0xff] %v235_v26   ;;  %v247_v29 = vld [vmem:[%s5088_s24 + $0x168] sm:$0xff]   ;;  %240 = vst [vmem:[%s5093_s25 + $0xd8] sm:$0xff] %v239_v27   ;;  %v251_v30 = vld [vmem:[%s5088_s24 + $0x170] sm:$0xff]  }
  0x23   : > { %244 = vst [vmem:[%s5093_s25 + $0xe0] sm:$0xff] %v243_v28   ;;  %248 = vst [vmem:[%s5093_s25 + $0xe8] sm:$0xff] %v247_v29   ;;  %v255_v31 = vld [vmem:[%s5088_s24 + $0x178] sm:$0xff]  }
  0x24   : > { %252 = vst [vmem:[%s5093_s25 + $0xf0] sm:$0xff] %v251_v30   ;;  %256 = vst [vmem:[%s5093_s25 + $0xf8] sm:$0xff] %v255_v31  }
  0x25 PF: > { %409 = sbr.rel (!%p5072_p4) target bundleno = 49 (0x31), region = 61  ;;  %s411_s26 = sand.u32 (%p5072_p4), 1, %s5019_s10  }
  0x26   : > { %s4364_s27 = sshll.u32 (%p5072_p4), %s5023_s11, 6  ;;  %s4173_s28 = sshll.u32 (%p5072_p4), %s411_s26, 7 }
  0x27   : > { %s5163_s3 = scalar_lea.vmem (%p5072_p4), %s6175_s1, %s4364_s27  ;;  %s413_s4 = scalar_lea.vmem (%p5072_p4), [#allocation3], %s4173_s28 }
  0x28   : > { %v432_v32 = vld [vmem:[%s5163_s3] sm:$0xff] (%p5072_p4)   ;;  %v436_v33 = vld [vmem:[%s5163_s3 + $0x8] sm:$0xff] (%p5072_p4)   ;;  %v440_v34 = vld [vmem:[%s5163_s3 + $0x10] sm:$0xff] (%p5072_p4)  }
  0x29   : > { %433 = vst [vmem:[%s413_s4] sm:$0xff] (%p5072_p4), %v432_v32   ;;  %437 = vst [vmem:[%s413_s4 + $0x8] sm:$0xff] (%p5072_p4), %v436_v33   ;;  %v444_v35 = vld [vmem:[%s5163_s3 + $0x18] sm:$0xff] (%p5072_p4)   ;;  %v448_v36 = vld [vmem:[%s5163_s3 + $0x20] sm:$0xff] (%p5072_p4)  }
  0x2a   : > { %441 = vst [vmem:[%s413_s4 + $0x10] sm:$0xff] (%p5072_p4), %v440_v34   ;;  %v452_v37 = vld [vmem:[%s5163_s3 + $0x28] sm:$0xff] (%p5072_p4)   ;;  %445 = vst [vmem:[%s413_s4 + $0x18] sm:$0xff] (%p5072_p4), %v444_v35   ;;  %v456_v38 = vld [vmem:[%s5163_s3 + $0x30] sm:$0xff] (%p5072_p4)  }
  0x2b   : > { %449 = vst [vmem:[%s413_s4 + $0x20] sm:$0xff] (%p5072_p4), %v448_v36   ;;  %453 = vst [vmem:[%s413_s4 + $0x28] sm:$0xff] (%p5072_p4), %v452_v37   ;;  %v460_v39 = vld [vmem:[%s5163_s3 + $0x38] sm:$0xff] (%p5072_p4)   ;;  %v464_v40 = vld [vmem:[%s5163_s3 + $0x80] sm:$0xff] (%p5072_p4)  }
  0x2c   : > { %457 = vst [vmem:[%s413_s4 + $0x30] sm:$0xff] %v456_v38   ;;  %461 = vst [vmem:[%s413_s4 + $0x38] sm:$0xff] %v460_v39   ;;  %v468_v41 = vld [vmem:[%s5163_s3 + $0x88] sm:$0xff]   ;;  %v472_v42 = vld [vmem:[%s5163_s3 + $0x90] sm:$0xff]  }
  0x2d   : > { %465 = vst [vmem:[%s413_s4 + $0x40] sm:$0xff] %v464_v40   ;;  %v476_v43 = vld [vmem:[%s5163_s3 + $0x98] sm:$0xff]   ;;  %469 = vst [vmem:[%s413_s4 + $0x48] sm:$0xff] %v468_v41   ;;  %v480_v44 = vld [vmem:[%s5163_s3 + $0xa0] sm:$0xff]  }
  0x2e   : > { %473 = vst [vmem:[%s413_s4 + $0x50] sm:$0xff] %v472_v42   ;;  %477 = vst [vmem:[%s413_s4 + $0x58] sm:$0xff] %v476_v43   ;;  %v484_v45 = vld [vmem:[%s5163_s3 + $0xa8] sm:$0xff]   ;;  %v488_v46 = vld [vmem:[%s5163_s3 + $0xb0] sm:$0xff]  }
  0x2f   : > { %481 = vst [vmem:[%s413_s4 + $0x60] sm:$0xff] %v480_v44   ;;  %485 = vst [vmem:[%s413_s4 + $0x68] sm:$0xff] %v484_v45   ;;  %v492_v47 = vld [vmem:[%s5163_s3 + $0xb8] sm:$0xff]  }
  0x30   : > { %489 = vst [vmem:[%s413_s4 + $0x70] sm:$0xff] %v488_v46   ;;  %493 = vst [vmem:[%s413_s4 + $0x78] sm:$0xff] %v492_v47  }
  0x31 PF: > { %p4176_p7 = scmp.ge.s32.totalorder %s5023_s11, 1  ;;  %p581_p8 = scmp.lt.s32.totalorder %s5023_s11, 3 }
  0x33   : > { %p582_p9 = pnand %p4176_p7, %p581_p8 }
  0x35   : > { %585 = sbr.rel (%p582_p9) target bundleno = 539 (0x21b), region = 102 }
  0x3c   : > { %s5184_s5 = sand.u32 1, %s5015_s9   ;;  %v5025_v48 = vmov 0.0   ;;  %vm730_vm0 = vcmask 1043456   ;;  %vm5026_vm1 = vmmov 0   ;;  %vm726_vm2 = vcmask 64512   ;;  %s4366_s17 = sshll.u32 (%p5076_p5), %s4165_s12, 8 }
  0x3d   : > { %4495 = vmatprep.subr.bf16.mxu0 %v5025_v48  ;;  %4501 = vmatprep.subr.bf16.mxu1 %v5025_v48  ;;  %s4177_s6 = sshll.u32 %s5184_s5, 8  ;;  %s4178_s7 = sshll.u32 %s5184_s5, 7 }
  0x3e   : > { %4497 = vmatprep.mubr.msk.bf16.mxu0 %vm5026_vm1, %v5025_v48  ;;  %4503 = vmatprep.mubr.msk.bf16.mxu1 %vm5026_vm1, %v5025_v48  ;;  %s5194_s8 = scalar_lea.vmem [#allocation3], %s4178_s7  ;;  %s5204_s9 = scalar_lea.vmem [#allocation2], %s4177_s6 }
  0x3f   : > { %v688_v49 = vld [vmem:[%s5194_s8] sm:$0xf]  ;;  %v689_v50 = vld [vmem:[%s5194_s8 + $0x4] sm:$0xf]  ;;  %v5210_v54 = vld [vmem:[%s5204_s9 + $0x8] sm:$0xff]   ;;  %s4179_s14 = sshll.u32 %s5184_s5, 9  ;;  %s6037_s18 = scalar_lea.vmem (%p5076_p5), %s6176_s2, %s4366_s17 }
  0x40   : > { %v5199_v51 = vsel %vm730_vm0, %v688_v49, 0  ;;  %v5202_v52 = vsel %vm730_vm0, %v689_v50, 0  ;;  %v5207_v53 = vld [vmem:[%s5204_s9] sm:$0xff]   ;;  %v690_v55 = vld [vmem:[%s5194_s8 + $0x8] sm:$0xf]  ;;  %v5235_v59 = vld [vmem:[%s5204_s9 + $0x10] sm:$0xff]  }
  0x41   : > { %4496 = vmatpush3.bf16.msra.mxu0 %v5199_v51  ;;  %4502 = vmatpush3.bf16.msra.mxu1 %v5202_v52  ;;  %v691_v56 = vld [vmem:[%s5194_s8 + $0xc] sm:$0xf]  ;;  %v5219_v57 = vsel %vm730_vm0, %v690_v55, 0  ;;  %v692_v60 = vld [vmem:[%s5194_s8 + $0x10] sm:$0xf]  ;;  %v5242_v62 = vld [vmem:[%s5204_s9 + $0x18] sm:$0xff]  }
  0x42   : > { %4507 = vmatprep.subr.bf16.mxu0 %v5025_v48  ;;  %4513 = vmatprep.subr.bf16.mxu1 %v5025_v48  ;;  %v5222_v58 = vsel %vm730_vm0, %v691_v56, 0  ;;  %v693_v61 = vld [vmem:[%s5194_s8 + $0x14] sm:$0xf]  ;;  %v5245_v63 = vsel %vm730_vm0, %v692_v60, 0  ;;  %v694_v1 = vld [vmem:[%s5194_s8 + $0x18] sm:$0xf] }
  0x43   : > { %v5248_v0 = vsel %vm730_vm0, %v693_v61, 0  ;;  %v695_v2 = vld [vmem:[%s5194_s8 + $0x1c] sm:$0xf]  ;;  %v5265_v3 = vld [vmem:[%s5204_s9 + $0x20] sm:$0xff]   ;;  %v5268_v4 = vld [vmem:[%s5204_s9 + $0x28] sm:$0xff]   ;;  %v5271_v5 = vsel %vm730_vm0, %v694_v1, 0 }
  0x44   : > { %4498 = vmatmul.mubr.msk.bf16.vlgmr.msra.gmra.mrb[0].mxu0 %vm726_vm2, %v5207_v53  ;;  %4504 = vmatmul.mubr.msk.bf16.vlgmr.msra.gmra.mrb[0].mxu1 %vm726_vm2, %v5210_v54  ;;  %v5274_v6 = vsel %vm730_vm0, %v695_v2, 0  ;;  %v696_v7 = vld [vmem:[%s5194_s8 + $0x20] sm:$0xf]  ;;  %v697_v8 = vld [vmem:[%s5194_s8 + $0x24] sm:$0xf]  ;;  %v5289_v9 = vld [vmem:[%s5204_s9 + $0x30] sm:$0xff]  }
  0x45   : > { %4508 = vmatpush3.bf16.msra.mxu0 %v5219_v57  ;;  %4514 = vmatpush3.bf16.msra.mxu1 %v5222_v58  ;;  %v5294_v10 = vld [vmem:[%s5204_s9 + $0x38] sm:$0xff]   ;;  %v5297_v11 = vsel %vm730_vm0, %v696_v7, 0  ;;  %v5300_v12 = vsel %vm730_vm0, %v697_v8, 0  ;;  %v4214_v13 = vld [vmem:[%s5194_s8 + $0x48] sm:$0xf]  ;;  %v5329_v21 = vld [vmem:[%s5204_s9 + $0x40] sm:$0xff]  }
  0x46   : > { %4509 = vmatprep.mubr.msk.bf16.mxu0 %vm5026_vm1, %v5025_v48  ;;  %4515 = vmatprep.mubr.msk.bf16.mxu1 %vm5026_vm1, %v5025_v48  ;;  %v4215_v14 = vld [vmem:[%s5194_s8 + $0x4c] sm:$0xf]  ;;  %v5305_v15 = vsel %vm730_vm0, %v4214_v13, 0  ;;  %v4216_v17 = vld [vmem:[%s5194_s8 + $0x50] sm:$0xf]  ;;  %v5386_v42 = vld [vmem:[%s5204_s9 + $0x58] sm:$0xff]  }
  0x47   : > { %4519 = vmatprep.subr.bf16.mxu0 %v5025_v48  ;;  %4525 = vmatprep.subr.bf16.mxu1 %v5025_v48  ;;  %v5308_v16 = vsel %vm730_vm0, %v4215_v14, 0  ;;  %v4217_v18 = vld [vmem:[%s5194_s8 + $0x54] sm:$0xf]  ;;  %v5319_v19 = vsel %vm730_vm0, %v4216_v17, 0  ;;  %v5332_v22 = vld [vmem:[%s5204_s9 + $0x48] sm:$0xff]   ;;  %v5425_v2 = vld [vmem:[%s5204_s9 + $0x60] sm:$0xff]  }
  0x48   : > { %v5322_v20 = vsel %vm730_vm0, %v4217_v18, 0  ;;  %v698_v23 = vld [vmem:[%s5194_s8 + $0x28] sm:$0xf]  ;;  %v699_v24 = vld [vmem:[%s5194_s8 + $0x2c] sm:$0xf]  ;;  %v5374_v38 = vld [vmem:[%s5204_s9 + $0x50] sm:$0xff]  }
  0x49   : > { %v4218_v25 = vld [vmem:[%s5194_s8 + $0x58] sm:$0xf]  ;;  %v4219_v26 = vld [vmem:[%s5194_s8 + $0x5c] sm:$0xf]  ;;  %v5347_v29 = vsel %vm730_vm0, %v698_v23, 0  ;;  %v5350_v30 = vsel %vm730_vm0, %v699_v24, 0 }
  0x4a   : > { %v5341_v27 = vsel %vm730_vm0, %v4218_v25, 0  ;;  %v5344_v28 = vsel %vm730_vm0, %v4219_v26, 0  ;;  %v4220_v31 = vld [vmem:[%s5194_s8 + $0x60] sm:$0xf]  ;;  %v4221_v32 = vld [vmem:[%s5194_s8 + $0x64] sm:$0xf] }
  0x4b   : > { %v5355_v33 = vsel %vm730_vm0, %v4220_v31, 0  ;;  %v5358_v34 = vsel %vm730_vm0, %v4221_v32, 0  ;;  %v700_v35 = vld [vmem:[%s5194_s8 + $0x30] sm:$0xf]  ;;  %v4222_v36 = vld [vmem:[%s5194_s8 + $0x68] sm:$0xf] }
  0x4c   : > { %4510 = vmatmul.mubr.msk.bf16.vlgmr.msra.gmra.mrb[4].mxu0 %vm726_vm2, %v5235_v59  ;;  %4516 = vmatmul.mubr.msk.bf16.vlgmr.msra.gmra.mrb[4].mxu1 %vm726_vm2, %v5242_v62  ;;  %v4223_v37 = vld [vmem:[%s5194_s8 + $0x6c] sm:$0xf]  ;;  %v5377_v39 = vsel %vm730_vm0, %v4222_v36, 0  ;;  %v701_v41 = vld [vmem:[%s5194_s8 + $0x34] sm:$0xf]  ;;  %v5397_v47 = vsel %vm730_vm0, %v700_v35, 0 }
  0x4d   : > { %4520 = vmatpush3.bf16.msra.mxu0 %v5245_v63  ;;  %4526 = vmatpush3.bf16.msra.mxu1 %v5248_v0  ;;  %v5380_v40 = vsel %vm730_vm0, %v4223_v37, 0  ;;  %v4224_v43 = vld [vmem:[%s5194_s8 + $0x70] sm:$0xf]  ;;  %v4225_v44 = vld [vmem:[%s5194_s8 + $0x74] sm:$0xf]  ;;  %v5400_v49 = vsel %vm730_vm0, %v701_v41, 0 }
  0x4e   : > { %4521 = vmatprep.mubr.msk.bf16.mxu0 %vm5026_vm1, %v5025_v48  ;;  %4527 = vmatprep.mubr.msk.bf16.mxu1 %vm5026_vm1, %v5025_v48  ;;  %v5391_v45 = vsel %vm730_vm0, %v4224_v43, 0  ;;  %v5394_v46 = vsel %vm730_vm0, %v4225_v44, 0  ;;  %v4226_v50 = vld [vmem:[%s5194_s8 + $0x78] sm:$0xf]  ;;  %v4227_v55 = vld [vmem:[%s5194_s8 + $0x7c] sm:$0xf] }
  0x4f   : > { %4531 = vmatprep.subr.bf16.mxu0 %v5025_v48  ;;  %4537 = vmatprep.subr.bf16.mxu1 %v5025_v48  ;;  %v5409_v56 = vsel %vm730_vm0, %v4226_v50, 0  ;;  %v5412_v60 = vsel %vm730_vm0, %v4227_v55, 0  ;;  %v702_v61 = vld [vmem:[%s5194_s8 + $0x38] sm:$0xf]  ;;  %v703_v1 = vld [vmem:[%s5194_s8 + $0x3c] sm:$0xf] }
  0x50   : > { %v5428_v7 = vld [vmem:[%s5204_s9 + $0x68] sm:$0xff]   ;;  %v5431_v8 = vsel %vm730_vm0, %v702_v61, 0  ;;  %v5434_v13 = vsel %vm730_vm0, %v703_v1, 0  ;;  %v4212_v14 = vld [vmem:[%s5194_s8 + $0x40] sm:$0xf]  ;;  %v5451_v18 = vld [vmem:[%s5204_s9 + $0x70] sm:$0xff]  }
  0x51   : > { %v4213_v17 = vld [vmem:[%s5194_s8 + $0x44] sm:$0xf]  ;;  %v5454_v23 = vld [vmem:[%s5204_s9 + $0x78] sm:$0xff]   ;;  %v5457_v24 = vsel %vm730_vm0, %v4212_v14, 0  ;;  %v5478_v31 = vld [vmem:[%s5204_s9 + $0x88] sm:$0xff]   ;;  %s5867_s15 = scalar_lea.vmem [#allocation4], %s4179_s14 }
  0x52   : > { %6180 = vst [vmem:[#allocation5_spill] sm:$0xff] %v5454_v23  ;;  %v5460_v25 = vsel %vm730_vm0, %v4213_v17, 0  ;;  %v5475_v26 = vld [vmem:[%s5204_s9 + $0x80] sm:$0xff]   ;;  %v5493_v32 = vld [vmem:[%s5204_s9 + $0x90] sm:$0xff]   ;;  %v5496_v35 = vld [vmem:[%s5204_s9 + $0x98] sm:$0xff]  }
  0x53   : > { %v5511_v36 = vld [vmem:[%s5204_s9 + $0xa0] sm:$0xff]   ;;  %v5514_v37 = vld [vmem:[%s5204_s9 + $0xa8] sm:$0xff]   ;;  %v5529_v41 = vld [vmem:[%s5204_s9 + $0xb0] sm:$0xff]  }
  0x54   : > { %4522 = vmatmul.mubr.msk.bf16.vlgmr.msra.gmra.mrb[8].mxu0 %vm726_vm2, %v5265_v3  ;;  %4528 = vmatmul.mubr.msk.bf16.vlgmr.msra.gmra.mrb[8].mxu1 %vm726_vm2, %v5268_v4  ;;  %v5532_v43 = vld [vmem:[%s5204_s9 + $0xb8] sm:$0xff]   ;;  %v5547_v44 = vld [vmem:[%s5204_s9 + $0xc0] sm:$0xff]   ;;  %v5550_v50 = vld [vmem:[%s5204_s9 + $0xc8] sm:$0xff]  }
  0x55   : > { %4532 = vmatpush3.bf16.msra.mxu0 %v5271_v5  ;;  %4538 = vmatpush3.bf16.msra.mxu1 %v5274_v6  ;;  %v5565_v55 = vld [vmem:[%s5204_s9 + $0xd0] sm:$0xff]   ;;  %v5568_v61 = vld [vmem:[%s5204_s9 + $0xd8] sm:$0xff]   ;;  %v5583_v1 = vld [vmem:[%s5204_s9 + $0xe0] sm:$0xff]  }
  0x56   : > { %4533 = vmatprep.mubr.msk.bf16.mxu0 %vm5026_vm1, %v5025_v48  ;;  %4539 = vmatprep.mubr.msk.bf16.mxu1 %vm5026_vm1, %v5025_v48  ;;  %v5586_v14 = vld [vmem:[%s5204_s9 + $0xe8] sm:$0xff]   ;;  %v5601_v17 = vld [vmem:[%s5204_s9 + $0xf0] sm:$0xff]  }
  0x57   : > { %4543 = vmatprep.subr.bf16.mxu0 %v5025_v48  ;;  %4549 = vmatprep.subr.bf16.mxu1 %v5025_v48 }
  0x5c   : > { %4534 = vmatmul.mubr.msk.bf16.vlgmr.msra.gmra.mrb[12].mxu0 %vm726_vm2, %v5289_v9  ;;  %4540 = vmatmul.mubr.msk.bf16.vlgmr.msra.gmra.mrb[12].mxu1 %vm726_vm2, %v5294_v10 }
  0x5d   : > { %4544 = vmatpush3.bf16.msra.mxu0 %v5297_v11  ;;  %4550 = vmatpush3.bf16.msra.mxu1 %v5300_v12 }
  0x5e   : > { %4545 = vmatprep.mubr.msk.bf16.mxu0 %vm5026_vm1, %v5025_v48  ;;  %4551 = vmatprep.mubr.msk.bf16.mxu1 %vm5026_vm1, %v5025_v48 }
  0x5f   : > { %4555 = vmatprep.subr.bf16.mxu0 %v5025_v48  ;;  %4561 = vmatprep.subr.bf16.mxu1 %v5025_v48 }
  0x64   : > { %4546 = vmatmul.mubr.msk.bf16.vlgmr.msra.gmra.mrb[16].mxu0 %vm726_vm2, %v5329_v21  ;;  %4552 = vmatmul.mubr.msk.bf16.vlgmr.msra.gmra.mrb[16].mxu1 %vm726_vm2, %v5332_v22 }
  0x65   : > { %4556 = vmatpush3.bf16.msra.mxu0 %v5347_v29  ;;  %4562 = vmatpush3.bf16.msra.mxu1 %v5350_v30 }
  0x66   : > { %4557 = vmatprep.mubr.msk.bf16.mxu0 %vm5026_vm1, %v5025_v48  ;;  %4563 = vmatprep.mubr.msk.bf16.mxu1 %vm5026_vm1, %v5025_v48 }
  0x67   : > { %4567 = vmatprep.subr.bf16.mxu0 %v5025_v48  ;;  %4573 = vmatprep.subr.bf16.mxu1 %v5025_v48 }
  0x6c   : > { %4558 = vmatmul.mubr.msk.bf16.vlgmr.msra.gmra.mrb[20].mxu0 %vm726_vm2, %v5374_v38  ;;  %4564 = vmatmul.mubr.msk.bf16.vlgmr.msra.gmra.mrb[20].mxu1 %vm726_vm2, %v5386_v42 }
  0x6d   : > { %4568 = vmatpush3.bf16.msra.mxu0 %v5397_v47  ;;  %4574 = vmatpush3.bf16.msra.mxu1 %v5400_v49 }
  0x6e   : > { %4569 = vmatprep.mubr.msk.bf16.mxu0 %vm5026_vm1, %v5025_v48  ;;  %4575 = vmatprep.mubr.msk.bf16.mxu1 %vm5026_vm1, %v5025_v48 }
  0x6f   : > { %4579 = vmatprep.subr.bf16.mxu0 %v5025_v48  ;;  %4585 = vmatprep.subr.bf16.mxu1 %v5025_v48 }
  0x74   : > { %4570 = vmatmul.mubr.msk.bf16.vlgmr.msra.gmra.mrb[24].mxu0 %vm726_vm2, %v5425_v2  ;;  %4576 = vmatmul.mubr.msk.bf16.vlgmr.msra.gmra.mrb[24].mxu1 %vm726_vm2, %v5428_v7 }
  0x75   : > { %4580 = vmatpush3.bf16.msra.mxu0 %v5431_v8  ;;  %4586 = vmatpush3.bf16.msra.mxu1 %v5434_v13 }
  0x76   : > { %4581 = vmatprep.mubr.msk.bf16.mxu0 %vm5026_vm1, %v5025_v48  ;;  %4587 = vmatprep.mubr.msk.bf16.mxu1 %vm5026_vm1, %v5025_v48 }
  0x77   : > { %4591 = vmatprep.subr.bf16.mxu0 %v5025_v48  ;;  %4597 = vmatprep.subr.bf16.mxu1 %v5025_v48 }
  0x7c   : > { %4582 = vmatmul.mubr.msk.bf16.vlgmr.msra.gmra.mrb[28].mxu0 %vm726_vm2, %v5451_v18  ;;  %4588 = vmatmul.mubr.msk.bf16.vlgmr.msra.gmra.mrb[28].mxu1 %vm726_vm2, %v5454_v23  ;;  %v5604_v23 = vld [vmem:[%s5204_s9 + $0xf8] sm:$0xff]  }
  0x7d   : > { %4592 = vmatpush3.bf16.msra.mxu0 %v5457_v24  ;;  %4598 = vmatpush3.bf16.msra.mxu1 %v5460_v25 }
  0x7e   : > { %4593 = vmatprep.mubr.msk.bf16.mxu0 %vm5026_vm1, %v5025_v48  ;;  %4599 = vmatprep.mubr.msk.bf16.mxu1 %vm5026_vm1, %v5025_v48 }
  0x7f   : > { %4603 = vmatprep.subr.bf16.mxu0 %v5025_v48  ;;  %4609 = vmatprep.subr.bf16.mxu1 %v5025_v48 }
  0x84   : > { %4594 = vmatmul.mubr.msk.bf16.vlgmr.msra.gmra.mrb[32].mxu0 %vm726_vm2, %v5475_v26  ;;  %4600 = vmatmul.mubr.msk.bf16.vlgmr.msra.gmra.mrb[32].mxu1 %vm726_vm2, %v5478_v31 }
  0x85   : > { %4604 = vmatpush3.bf16.msra.mxu0 %v5305_v15  ;;  %4610 = vmatpush3.bf16.msra.mxu1 %v5308_v16 }
  0x86   : > { %4605 = vmatprep.mubr.msk.bf16.mxu0 %vm5026_vm1, %v5025_v48  ;;  %4611 = vmatprep.mubr.msk.bf16.mxu1 %vm5026_vm1, %v5025_v48 }
  0x87   : > { %4615 = vmatprep.subr.bf16.mxu0 %v5025_v48  ;;  %4621 = vmatprep.subr.bf16.mxu1 %v5025_v48 }
  0x8c   : > { %4606 = vmatmul.mubr.msk.bf16.vlgmr.msra.gmra.mrb[36].mxu0 %vm726_vm2, %v5493_v32  ;;  %4612 = vmatmul.mubr.msk.bf16.vlgmr.msra.gmra.mrb[36].mxu1 %vm726_vm2, %v5496_v35 }
  0x8d   : > { %4616 = vmatpush3.bf16.msra.mxu0 %v5319_v19  ;;  %4622 = vmatpush3.bf16.msra.mxu1 %v5322_v20 }
  0x8e   : > { %4617 = vmatprep.mubr.msk.bf16.mxu0 %vm5026_vm1, %v5025_v48  ;;  %4623 = vmatprep.mubr.msk.bf16.mxu1 %vm5026_vm1, %v5025_v48 }
  0x8f   : > { %4627 = vmatprep.subr.bf16.mxu0 %v5025_v48  ;;  %4633 = vmatprep.subr.bf16.mxu1 %v5025_v48 }
  0x94   : > { %4618 = vmatmul.mubr.msk.bf16.vlgmr.msra.gmra.mrb[40].mxu0 %vm726_vm2, %v5511_v36  ;;  %4624 = vmatmul.mubr.msk.bf16.vlgmr.msra.gmra.mrb[40].mxu1 %vm726_vm2, %v5514_v37 }
  0x95   : > { %4628 = vmatpush3.bf16.msra.mxu0 %v5341_v27  ;;  %4634 = vmatpush3.bf16.msra.mxu1 %v5344_v28 }
  0x96   : > { %4629 = vmatprep.mubr.msk.bf16.mxu0 %vm5026_vm1, %v5025_v48  ;;  %4635 = vmatprep.mubr.msk.bf16.mxu1 %vm5026_vm1, %v5025_v48 }
  0x97   : > { %4639 = vmatprep.subr.bf16.mxu0 %v5025_v48  ;;  %4645 = vmatprep.subr.bf16.mxu1 %v5025_v48 }
  0x9c   : > { %4630 = vmatmul.mubr.msk.bf16.vlgmr.msra.gmra.mrb[44].mxu0 %vm726_vm2, %v5529_v41  ;;  %4636 = vmatmul.mubr.msk.bf16.vlgmr.msra.gmra.mrb[44].mxu1 %vm726_vm2, %v5532_v43 }
  0x9d   : > { %4640 = vmatpush3.bf16.msra.mxu0 %v5355_v33  ;;  %4646 = vmatpush3.bf16.msra.mxu1 %v5358_v34 }
  0x9e   : > { %4641 = vmatprep.mubr.msk.bf16.mxu0 %vm5026_vm1, %v5025_v48  ;;  %4647 = vmatprep.mubr.msk.bf16.mxu1 %vm5026_vm1, %v5025_v48 }
  0x9f   : > { %4651 = vmatprep.subr.bf16.mxu0 %v5025_v48  ;;  %4657 = vmatprep.subr.bf16.mxu1 %v5025_v48 }
  0xa4   : > { %4642 = vmatmul.mubr.msk.bf16.vlgmr.msra.gmra.mrb[48].mxu0 %vm726_vm2, %v5547_v44  ;;  %4648 = vmatmul.mubr.msk.bf16.vlgmr.msra.gmra.mrb[48].mxu1 %vm726_vm2, %v5550_v50 }
  0xa5   : > { %4652 = vmatpush3.bf16.msra.mxu0 %v5377_v39  ;;  %4658 = vmatpush3.bf16.msra.mxu1 %v5380_v40 }
  0xa6   : > { %4653 = vmatprep.mubr.msk.bf16.mxu0 %vm5026_vm1, %v5025_v48  ;;  %4659 = vmatprep.mubr.msk.bf16.mxu1 %vm5026_vm1, %v5025_v48 }
  0xa7   : > { %4663 = vmatprep.subr.bf16.mxu0 %v5025_v48  ;;  %4669 = vmatprep.subr.bf16.mxu1 %v5025_v48 }
  0xac   : > { %4654 = vmatmul.mubr.msk.bf16.vlgmr.msra.gmra.mrb[52].mxu0 %vm726_vm2, %v5565_v55  ;;  %4660 = vmatmul.mubr.msk.bf16.vlgmr.msra.gmra.mrb[52].mxu1 %vm726_vm2, %v5568_v61 }
  0xad   : > { %4664 = vmatpush3.bf16.msra.mxu0 %v5391_v45  ;;  %4670 = vmatpush3.bf16.msra.mxu1 %v5394_v46 }
  0xae   : > { %4665 = vmatprep.mubr.msk.bf16.mxu0 %vm5026_vm1, %v5025_v48  ;;  %4671 = vmatprep.mubr.msk.bf16.mxu1 %vm5026_vm1, %v5025_v48 }
  0xaf   : > { %4675 = vmatprep.subr.bf16.mxu0 %v5025_v48  ;;  %4681 = vmatprep.subr.bf16.mxu1 %v5025_v48 }
  0xb4   : > { %4666 = vmatmul.mubr.msk.bf16.vlgmr.msra.gmra.mrb[56].mxu0 %vm726_vm2, %v5583_v1  ;;  %4672 = vmatmul.mubr.msk.bf16.vlgmr.msra.gmra.mrb[56].mxu1 %vm726_vm2, %v5586_v14 }
  0xb5   : > { %4676 = vmatpush3.bf16.msra.mxu0 %v5409_v56  ;;  %4682 = vmatpush3.bf16.msra.mxu1 %v5412_v60 }
  0xb6   : > { %4677 = vmatprep.mubr.msk.bf16.mxu0 %vm5026_vm1, %v5025_v48  ;;  %4683 = vmatprep.mubr.msk.bf16.mxu1 %vm5026_vm1, %v5025_v48 }
  0xb7   : > { %4687 = vmatprep.subr.bf16.mxu0 %v5025_v48  ;;  %4693 = vmatprep.subr.bf16.mxu1 %v5025_v48 }
  0xbc   : > { %4678 = vmatmul.mubr.msk.bf16.vlgmr.msra.gmra.mrb[60].mxu0 %vm726_vm2, %v5601_v17  ;;  %4684 = vmatmul.mubr.msk.bf16.vlgmr.msra.gmra.mrb[60].mxu1 %vm726_vm2, %v5604_v23 }
  0xbd   : > { %4688 = vmatpush3.bf16.msra.mxu0 %v5199_v51  ;;  %4694 = vmatpush3.bf16.msra.mxu1 %v5202_v52 }
  0xbe   : > { %4689 = vmatprep.mubr.msk.bf16.mxu0 %vm5026_vm1, %v5025_v48  ;;  %4695 = vmatprep.mubr.msk.bf16.mxu1 %vm5026_vm1, %v5025_v48 }
  0xbf   : > { %4699 = vmatprep.subr.bf16.mxu0 %v5025_v48  ;;  %4705 = vmatprep.subr.bf16.mxu1 %v5025_v48 }
  0xc4   : > { %4690 = vmatmul.mubr.msk.bf16.vlgmr.msra.gmra.mrb[64].mxu0 %vm726_vm2, %v5475_v26  ;;  %4696 = vmatmul.mubr.msk.bf16.vlgmr.msra.gmra.mrb[64].mxu1 %vm726_vm2, %v5478_v31 }
  0xc5   : > { %4700 = vmatpush3.bf16.msra.mxu0 %v5219_v57  ;;  %4706 = vmatpush3.bf16.msra.mxu1 %v5222_v58 }
  0xc6   : > { %4701 = vmatprep.mubr.msk.bf16.mxu0 %vm5026_vm1, %v5025_v48  ;;  %4707 = vmatprep.mubr.msk.bf16.mxu1 %vm5026_vm1, %v5025_v48 }
  0xc7   : > { %4711 = vmatprep.subr.bf16.mxu0 %v5025_v48  ;;  %4717 = vmatprep.subr.bf16.mxu1 %v5025_v48 }
  0xcc   : > { %4702 = vmatmul.mubr.msk.bf16.vlgmr.msra.gmra.mrb[68].mxu0 %vm726_vm2, %v5493_v32  ;;  %4708 = vmatmul.mubr.msk.bf16.vlgmr.msra.gmra.mrb[68].mxu1 %vm726_vm2, %v5496_v35 }
  0xcd   : > { %4712 = vmatpush3.bf16.msra.mxu0 %v5245_v63  ;;  %4718 = vmatpush3.bf16.msra.mxu1 %v5248_v0 }
  0xce   : > { %4713 = vmatprep.mubr.msk.bf16.mxu0 %vm5026_vm1, %v5025_v48  ;;  %4719 = vmatprep.mubr.msk.bf16.mxu1 %vm5026_vm1, %v5025_v48 }
  0xcf   : > { %4723 = vmatprep.subr.bf16.mxu0 %v5025_v48  ;;  %4729 = vmatprep.subr.bf16.mxu1 %v5025_v48 }
  0xd4   : > { %4714 = vmatmul.mubr.msk.bf16.vlgmr.msra.gmra.mrb[72].mxu0 %vm726_vm2, %v5511_v36  ;;  %4720 = vmatmul.mubr.msk.bf16.vlgmr.msra.gmra.mrb[72].mxu1 %vm726_vm2, %v5514_v37 }
  0xd5   : > { %4724 = vmatpush3.bf16.msra.mxu0 %v5271_v5  ;;  %4730 = vmatpush3.bf16.msra.mxu1 %v5274_v6 }
  0xd6   : > { %4725 = vmatprep.mubr.msk.bf16.mxu0 %vm5026_vm1, %v5025_v48  ;;  %4731 = vmatprep.mubr.msk.bf16.mxu1 %vm5026_vm1, %v5025_v48 }
  0xd7   : > { %4735 = vmatprep.subr.bf16.mxu0 %v5025_v48  ;;  %4741 = vmatprep.subr.bf16.mxu1 %v5025_v48 }
  0xdc   : > { %4726 = vmatmul.mubr.msk.bf16.vlgmr.msra.gmra.mrb[76].mxu0 %vm726_vm2, %v5529_v41  ;;  %4732 = vmatmul.mubr.msk.bf16.vlgmr.msra.gmra.mrb[76].mxu1 %vm726_vm2, %v5532_v43 }
  0xdd   : > { %4736 = vmatpush3.bf16.msra.mxu0 %v5297_v11  ;;  %4742 = vmatpush3.bf16.msra.mxu1 %v5300_v12 }
  0xde   : > { %4737 = vmatprep.mubr.msk.bf16.mxu0 %vm5026_vm1, %v5025_v48  ;;  %4743 = vmatprep.mubr.msk.bf16.mxu1 %vm5026_vm1, %v5025_v48 }
  0xdf   : > { %4747 = vmatprep.subr.bf16.mxu0 %v5025_v48  ;;  %4753 = vmatprep.subr.bf16.mxu1 %v5025_v48 }
  0xe4   : > { %4738 = vmatmul.mubr.msk.bf16.vlgmr.msra.gmra.mrb[80].mxu0 %vm726_vm2, %v5547_v44  ;;  %4744 = vmatmul.mubr.msk.bf16.vlgmr.msra.gmra.mrb[80].mxu1 %vm726_vm2, %v5550_v50 }
  0xe5   : > { %4748 = vmatpush3.bf16.msra.mxu0 %v5347_v29  ;;  %4754 = vmatpush3.bf16.msra.mxu1 %v5350_v30 }
  0xe6   : > { %4749 = vmatprep.mubr.msk.bf16.mxu0 %vm5026_vm1, %v5025_v48  ;;  %4755 = vmatprep.mubr.msk.bf16.mxu1 %vm5026_vm1, %v5025_v48 }
  0xe7   : > { %4759 = vmatprep.subr.bf16.mxu0 %v5025_v48  ;;  %4765 = vmatprep.subr.bf16.mxu1 %v5025_v48 }
  0xec   : > { %4750 = vmatmul.mubr.msk.bf16.vlgmr.msra.gmra.mrb[84].mxu0 %vm726_vm2, %v5565_v55  ;;  %4756 = vmatmul.mubr.msk.bf16.vlgmr.msra.gmra.mrb[84].mxu1 %vm726_vm2, %v5568_v61 }
  0xed   : > { %4760 = vmatpush3.bf16.msra.mxu0 %v5397_v47  ;;  %4766 = vmatpush3.bf16.msra.mxu1 %v5400_v49 }
  0xee   : > { %4761 = vmatprep.mubr.msk.bf16.mxu0 %vm5026_vm1, %v5025_v48  ;;  %4767 = vmatprep.mubr.msk.bf16.mxu1 %vm5026_vm1, %v5025_v48 }
  0xef   : > { %4771 = vmatprep.subr.bf16.mxu0 %v5025_v48  ;;  %4777 = vmatprep.subr.bf16.mxu1 %v5025_v48 }
  0xf4   : > { %4762 = vmatmul.mubr.msk.bf16.vlgmr.msra.gmra.mrb[88].mxu0 %vm726_vm2, %v5583_v1  ;;  %4768 = vmatmul.mubr.msk.bf16.vlgmr.msra.gmra.mrb[88].mxu1 %vm726_vm2, %v5586_v14 }
  0xf5   : > { %4772 = vmatpush3.bf16.msra.mxu0 %v5431_v8  ;;  %4778 = vmatpush3.bf16.msra.mxu1 %v5434_v13 }
  0xf6   : > { %4773 = vmatprep.mubr.msk.bf16.mxu0 %vm5026_vm1, %v5025_v48  ;;  %4779 = vmatprep.mubr.msk.bf16.mxu1 %vm5026_vm1, %v5025_v48 }
  0xf7   : > { %4783 = vmatprep.subr.bf16.mxu0 %v5025_v48  ;;  %4789 = vmatprep.subr.bf16.mxu1 %v5025_v48 }
  0xfc   : > { %4774 = vmatmul.mubr.msk.bf16.vlgmr.msra.gmra.mrb[92].mxu0 %vm726_vm2, %v5601_v17  ;;  %4780 = vmatmul.mubr.msk.bf16.vlgmr.msra.gmra.mrb[92].mxu1 %vm726_vm2, %v5604_v23 }
  0xfd   : > { %4784 = vmatpush3.bf16.msra.mxu0 %v5457_v24  ;;  %4790 = vmatpush3.bf16.msra.mxu1 %v5460_v25 }
  0xfe   : > { %4785 = vmatprep.mubr.msk.bf16.mxu0 %vm5026_vm1, %v5025_v48  ;;  %4791 = vmatprep.mubr.msk.bf16.mxu1 %vm5026_vm1, %v5025_v48 }
  0xff   : > { %4795 = vmatprep.subr.bf16.mxu0 %v5025_v48  ;;  %4801 = vmatprep.subr.bf16.mxu1 %v5025_v48 }
 0x104   : > { %4786 = vmatmul.mubr.msk.bf16.vlgmr.msra.gmra.mrb[64].mxu0 %vm726_vm2, %v5207_v53  ;;  %4792 = vmatmul.mubr.msk.bf16.vlgmr.msra.gmra.mrb[64].mxu1 %vm726_vm2, %v5210_v54 }
 0x105   : > { %4796 = vmatpush3.bf16.msra.mxu0 %v5305_v15  ;;  %4802 = vmatpush3.bf16.msra.mxu1 %v5308_v16 }
 0x106   : > { %4797 = vmatprep.mubr.msk.bf16.mxu0 %vm5026_vm1, %v5025_v48  ;;  %4803 = vmatprep.mubr.msk.bf16.mxu1 %vm5026_vm1, %v5025_v48 }
 0x107   : > { %4807 = vmatprep.subr.bf16.mxu0 %v5025_v48  ;;  %4813 = vmatprep.subr.bf16.mxu1 %v5025_v48 }
 0x10c   : > { %4798 = vmatmul.mubr.msk.bf16.vlgmr.msra.gmra.mrb[68].mxu0 %vm726_vm2, %v5235_v59  ;;  %4804 = vmatmul.mubr.msk.bf16.vlgmr.msra.gmra.mrb[68].mxu1 %vm726_vm2, %v5242_v62 }
 0x10d   : > { %4808 = vmatpush3.bf16.msra.mxu0 %v5319_v19  ;;  %4814 = vmatpush3.bf16.msra.mxu1 %v5322_v20 }
 0x10e   : > { %4809 = vmatprep.mubr.msk.bf16.mxu0 %vm5026_vm1, %v5025_v48  ;;  %4815 = vmatprep.mubr.msk.bf16.mxu1 %vm5026_vm1, %v5025_v48 }
 0x10f   : > { %4819 = vmatprep.subr.bf16.mxu0 %v5025_v48  ;;  %4825 = vmatprep.subr.bf16.mxu1 %v5025_v48 }
 0x114   : > { %4810 = vmatmul.mubr.msk.bf16.vlgmr.msra.gmra.mrb[72].mxu0 %vm726_vm2, %v5265_v3  ;;  %4816 = vmatmul.mubr.msk.bf16.vlgmr.msra.gmra.mrb[72].mxu1 %vm726_vm2, %v5268_v4 }
 0x115   : > { %4820 = vmatpush3.bf16.msra.mxu0 %v5341_v27  ;;  %4826 = vmatpush3.bf16.msra.mxu1 %v5344_v28 }
 0x116   : > { %4821 = vmatprep.mubr.msk.bf16.mxu0 %vm5026_vm1, %v5025_v48  ;;  %4827 = vmatprep.mubr.msk.bf16.mxu1 %vm5026_vm1, %v5025_v48 }
 0x117   : > { %v5748_v51 = vpop.f32.mrb[0].mxu0  ;;  %v5750_v52 = vpop.f32.mrb[0].mxu1  ;;  %4831 = vmatprep.subr.bf16.mxu0 %v5025_v48  ;;  %4837 = vmatprep.subr.bf16.mxu1 %v5025_v48 }
 0x118   : > { %v4499_v53 = vpop.f32.mrb[1].mxu0  ;;  %v4505_v54 = vpop.f32.mrb[1].mxu1 }
 0x119   : > { %v5754_v57 = vpop.f32.mrb[2].mxu0  ;;  %v5756_v58 = vpop.f32.mrb[2].mxu1 }
 0x11a   : > { %v4500_v59 = vpop.f32.mrb[3].mxu0  ;;  %v4506_v62 = vpop.f32.mrb[3].mxu1 }
 0x11c   : > { %4822 = vmatmul.mubr.msk.bf16.vlgmr.msra.gmra.mrb[76].mxu0 %vm726_vm2, %v5289_v9  ;;  %4828 = vmatmul.mubr.msk.bf16.vlgmr.msra.gmra.mrb[76].mxu1 %vm726_vm2, %v5294_v10 }
 0x11d   : > { %4832 = vmatpush3.bf16.msra.mxu0 %v5355_v33  ;;  %4838 = vmatpush3.bf16.msra.mxu1 %v5358_v34 }
 0x11e   : > { %4833 = vmatprep.mubr.msk.bf16.mxu0 %vm5026_vm1, %v5025_v48  ;;  %4839 = vmatprep.mubr.msk.bf16.mxu1 %vm5026_vm1, %v5025_v48 }
 0x11f   : > { %v5768_v63 = vpop.f32.mrb[4].mxu0  ;;  %v5770_v0 = vpop.f32.mrb[4].mxu1  ;;  %4843 = vmatprep.subr.bf16.mxu0 %v5025_v48  ;;  %4849 = vmatprep.subr.bf16.mxu1 %v5025_v48 }
 0x120   : > { %v4511_v3 = vpop.f32.mrb[5].mxu0  ;;  %v4517_v4 = vpop.f32.mrb[5].mxu1 }
 0x121   : > { %v5774_v5 = vpop.f32.mrb[6].mxu0  ;;  %v5776_v6 = vpop.f32.mrb[6].mxu1 }
 0x122   : > { %v4512_v9 = vpop.f32.mrb[7].mxu0  ;;  %v4518_v10 = vpop.f32.mrb[7].mxu1 }
 0x124   : > { %4834 = vmatmul.mubr.msk.bf16.vlgmr.msra.gmra.mrb[80].mxu0 %vm726_vm2, %v5329_v21  ;;  %4840 = vmatmul.mubr.msk.bf16.vlgmr.msra.gmra.mrb[80].mxu1 %vm726_vm2, %v5332_v22 }
 0x125   : > { %4844 = vmatpush3.bf16.msra.mxu0 %v5377_v39  ;;  %4850 = vmatpush3.bf16.msra.mxu1 %v5380_v40 }
 0x126   : > { %4845 = vmatprep.mubr.msk.bf16.mxu0 %vm5026_vm1, %v5025_v48  ;;  %4851 = vmatprep.mubr.msk.bf16.mxu1 %vm5026_vm1, %v5025_v48 }
 0x127   : > { %v5788_v11 = vpop.f32.mrb[8].mxu0  ;;  %v5790_v12 = vpop.f32.mrb[8].mxu1  ;;  %4855 = vmatprep.subr.bf16.mxu0 %v5025_v48  ;;  %4861 = vmatprep.subr.bf16.mxu1 %v5025_v48 }
 0x128   : > { %v4523_v15 = vpop.f32.mrb[9].mxu0  ;;  %v4529_v16 = vpop.f32.mrb[9].mxu1 }
 0x129   : > { %v5794_v19 = vpop.f32.mrb[10].mxu0  ;;  %v5796_v20 = vpop.f32.mrb[10].mxu1 }
 0x12a   : > { %v4524_v21 = vpop.f32.mrb[11].mxu0  ;;  %v4530_v22 = vpop.f32.mrb[11].mxu1 }
 0x12c   : > { %4846 = vmatmul.mubr.msk.bf16.vlgmr.msra.gmra.mrb[84].mxu0 %vm726_vm2, %v5374_v38  ;;  %4852 = vmatmul.mubr.msk.bf16.vlgmr.msra.gmra.mrb[84].mxu1 %vm726_vm2, %v5386_v42 }
 0x12d   : > { %4856 = vmatpush3.bf16.msra.mxu0 %v5391_v45  ;;  %4862 = vmatpush3.bf16.msra.mxu1 %v5394_v46 }
 0x12e   : > { %4857 = vmatprep.mubr.msk.bf16.mxu0 %vm5026_vm1, %v5025_v48  ;;  %4863 = vmatprep.mubr.msk.bf16.mxu1 %vm5026_vm1, %v5025_v48 }
 0x12f   : > { %v5808_v27 = vpop.f32.mrb[12].mxu0  ;;  %v5810_v28 = vpop.f32.mrb[12].mxu1  ;;  %4867 = vmatprep.subr.bf16.mxu0 %v5025_v48  ;;  %4873 = vmatprep.subr.bf16.mxu1 %v5025_v48 }
 0x130   : > { %v4535_v29 = vpop.f32.mrb[13].mxu0  ;;  %v4541_v30 = vpop.f32.mrb[13].mxu1 }
 0x131   : > { %v5814_v33 = vpop.f32.mrb[14].mxu0  ;;  %v5816_v34 = vpop.f32.mrb[14].mxu1 }
 0x132   : > { %v4536_v38 = vpop.f32.mrb[15].mxu0  ;;  %v4542_v39 = vpop.f32.mrb[15].mxu1 }
 0x134   : > { %4858 = vmatmul.mubr.msk.bf16.vlgmr.msra.gmra.mrb[88].mxu0 %vm726_vm2, %v5425_v2  ;;  %4864 = vmatmul.mubr.msk.bf16.vlgmr.msra.gmra.mrb[88].mxu1 %vm726_vm2, %v5428_v7 }
 0x135   : > { %4868 = vmatpush3.bf16.msra.mxu0 %v5409_v56  ;;  %4874 = vmatpush3.bf16.msra.mxu1 %v5412_v60  ;;  %v6181_v60 = vld [vmem:[#allocation5_spill] sm:$0xff] }
 0x136   : > { %4869 = vmatprep.mubr.msk.bf16.mxu0 %vm5026_vm1, %v5025_v48  ;;  %4875 = vmatprep.mubr.msk.bf16.mxu1 %vm5026_vm1, %v5025_v48 }
 0x137   : > { %v5828_v40 = vpop.f32.mrb[16].mxu0  ;;  %v5830_v42 = vpop.f32.mrb[16].mxu1 }
 0x138   : > { %v4547_v45 = vpop.f32.mrb[17].mxu0  ;;  %v4553_v46 = vpop.f32.mrb[17].mxu1 }
 0x139   : > { %v5832_v47 = vpop.f32.mrb[18].mxu0  ;;  %v5834_v49 = vpop.f32.mrb[18].mxu1 }
 0x13a   : > { %v4548_v2 = vpop.f32.mrb[19].mxu0  ;;  %v4554_v56 = vpop.f32.mrb[19].mxu1 }
 0x13c   : > { %4870 = vmatmul.mubr.msk.bf16.vlgmr.msra.gmra.mrb[92].mxu0 %vm726_vm2, %v5451_v18  ;;  %4876 = vmatmul.mubr.msk.bf16.vlgmr.msra.gmra.mrb[92].mxu1 %vm726_vm2, %v6181_v60 }
 0x13f   : > { %v5840_v7 = vpop.f32.mrb[20].mxu0  ;;  %v5842_v48 = vpop.f32.mrb[20].mxu1 }
 0x140   : > { %v4559_v8 = vpop.f32.mrb[21].mxu0  ;;  %v4565_v13 = vpop.f32.mrb[21].mxu1 }
 0x141   : > { %v5844_v23 = vpop.f32.mrb[22].mxu0  ;;  %v5846_v24 = vpop.f32.mrb[22].mxu1 }
 0x142   : > { %v4560_v25 = vpop.f32.mrb[23].mxu0  ;;  %v4566_v26 = vpop.f32.mrb[23].mxu1 }
 0x147   : > { %v5848_v31 = vpop.f32.mrb[24].mxu0  ;;  %v5850_v32 = vpop.f32.mrb[24].mxu1 }
 0x148   : > { %v4571_v18 = vpop.f32.mrb[25].mxu0  ;;  %v4577_v35 = vpop.f32.mrb[25].mxu1 }
 0x149   : > { %v5852_v36 = vpop.f32.mrb[26].mxu0  ;;  %v5854_v37 = vpop.f32.mrb[26].mxu1 }
 0x14a   : > { %v4572_v41 = vpop.f32.mrb[27].mxu0  ;;  %v4578_v43 = vpop.f32.mrb[27].mxu1 }
 0x14f   : > { %v5856_v44 = vpop.f32.mrb[28].mxu0  ;;  %v5858_v50 = vpop.f32.mrb[28].mxu1 }
 0x150   : > { %v4583_v55 = vpop.f32.mrb[29].mxu0  ;;  %v4589_v61 = vpop.f32.mrb[29].mxu1 }
 0x151   : > { %v5860_v1 = vpop.f32.mrb[30].mxu0  ;;  %v5862_v14 = vpop.f32.mrb[30].mxu1 }
 0x152   : > { %v4584_v17 = vpop.f32.mrb[31].mxu0  ;;  %v4590_v53 = vpop.f32.mrb[31].mxu1 }
 0x157   : > { %v1600_v54 = vpop.f32.mrb[32].mxu0  ;;  %v1652_v59 = vpop.f32.mrb[32].mxu1 }
 0x158   : > { %v3043_v62 = vsub.f32 %v5748_v51, %v1600_v54  ;;  %v3045_v3 = vsub.f32 %v5750_v52, %v1652_v59  ;;  %v4595_v4 = vpop.f32.mrb[33].mxu0  ;;  %v4601_v9 = vpop.f32.mrb[33].mxu1 }
 0x159   : > { %v1603_v10 = vpop.f32.mrb[34].mxu0  ;;  %v1655_v15 = vpop.f32.mrb[34].mxu1 }
 0x15a   : > { %3075 = vst.msk [vmem:[%s5867_s15] sm:$0xff] %vm726_vm2, %v3043_v62  ;;  %3077 = vst.msk [vmem:[%s5867_s15 + $0x10] sm:$0xff] %vm726_vm2, %v3045_v3  ;;  %v3044_v51 = vsub.f32 %v5754_v57, %v1603_v10  ;;  %v3046_v52 = vsub.f32 %v5756_v58, %v1655_v15  ;;  %v4596_v16 = vpop.f32.mrb[35].mxu0  ;;  %v4602_v21 = vpop.f32.mrb[35].mxu1 }
 0x15c   : > { %3076 = vst.msk [vmem:[%s5867_s15 + $0x8] sm:$0xff] %vm726_vm2, %v3044_v51  ;;  %3078 = vst.msk [vmem:[%s5867_s15 + $0x18] sm:$0xff] %vm726_vm2, %v3046_v52 }
 0x15f   : > { %v1704_v22 = vpop.f32.mrb[36].mxu0  ;;  %v1756_v29 = vpop.f32.mrb[36].mxu1 }
 0x160   : > { %v3047_v30 = vsub.f32 %v5768_v63, %v1704_v22  ;;  %v3049_v38 = vsub.f32 %v5770_v0, %v1756_v29  ;;  %v4607_v39 = vpop.f32.mrb[37].mxu0  ;;  %v4613_v45 = vpop.f32.mrb[37].mxu1 }
 0x161   : > { %v1707_v46 = vpop.f32.mrb[38].mxu0  ;;  %v1759_v57 = vpop.f32.mrb[38].mxu1 }
 0x162   : > { %3079 = vst.msk [vmem:[%s5867_s15 + $0x20] sm:$0xff] %vm726_vm2, %v3047_v30  ;;  %3081 = vst.msk [vmem:[%s5867_s15 + $0x30] sm:$0xff] %vm726_vm2, %v3049_v38  ;;  %v3048_v58 = vsub.f32 %v5774_v5, %v1707_v46  ;;  %v3050_v2 = vsub.f32 %v5776_v6, %v1759_v57  ;;  %v4608_v56 = vpop.f32.mrb[39].mxu0  ;;  %v4614_v60 = vpop.f32.mrb[39].mxu1 }
 0x164   : > { %3080 = vst.msk [vmem:[%s5867_s15 + $0x28] sm:$0xff] %vm726_vm2, %v3048_v58  ;;  %3082 = vst.msk [vmem:[%s5867_s15 + $0x38] sm:$0xff] %vm726_vm2, %v3050_v2 }
 0x167   : > { %v1808_v63 = vpop.f32.mrb[40].mxu0  ;;  %v1860_v0 = vpop.f32.mrb[40].mxu1 }
 0x168   : > { %v3051_v8 = vsub.f32 %v5788_v11, %v1808_v63  ;;  %v3053_v13 = vsub.f32 %v5790_v12, %v1860_v0  ;;  %v4619_v25 = vpop.f32.mrb[41].mxu0  ;;  %v4625_v26 = vpop.f32.mrb[41].mxu1 }
 0x169   : > { %v1811_v18 = vpop.f32.mrb[42].mxu0  ;;  %v1863_v5 = vpop.f32.mrb[42].mxu1 }
 0x16a   : > { %3083 = vst.msk [vmem:[%s5867_s15 + $0x40] sm:$0xff] %vm726_vm2, %v3051_v8  ;;  %3085 = vst.msk [vmem:[%s5867_s15 + $0x50] sm:$0xff] %vm726_vm2, %v3053_v13  ;;  %v3052_v6 = vsub.f32 %v5794_v19, %v1811_v18  ;;  %v3054_v35 = vsub.f32 %v5796_v20, %v1863_v5  ;;  %v4620_v41 = vpop.f32.mrb[43].mxu0  ;;  %v4626_v43 = vpop.f32.mrb[43].mxu1 }
 0x16c   : > { %3084 = vst.msk [vmem:[%s5867_s15 + $0x48] sm:$0xff] %vm726_vm2, %v3052_v6  ;;  %3086 = vst.msk [vmem:[%s5867_s15 + $0x58] sm:$0xff] %vm726_vm2, %v3054_v35 }
 0x16f   : > { %v1912_v11 = vpop.f32.mrb[44].mxu0  ;;  %v1964_v12 = vpop.f32.mrb[44].mxu1 }
 0x170   : > { %v3055_v55 = vsub.f32 %v5808_v27, %v1912_v11  ;;  %v3057_v61 = vsub.f32 %v5810_v28, %v1964_v12  ;;  %v4631_v17 = vpop.f32.mrb[45].mxu0  ;;  %v4637_v53 = vpop.f32.mrb[45].mxu1 }
 0x171   : > { %v1915_v54 = vpop.f32.mrb[46].mxu0  ;;  %v1967_v19 = vpop.f32.mrb[46].mxu1 }
 0x172   : > { %3087 = vst.msk [vmem:[%s5867_s15 + $0x60] sm:$0xff] %vm726_vm2, %v3055_v55  ;;  %3089 = vst.msk [vmem:[%s5867_s15 + $0x70] sm:$0xff] %vm726_vm2, %v3057_v61  ;;  %v3056_v20 = vsub.f32 %v5814_v33, %v1915_v54  ;;  %v3058_v59 = vsub.f32 %v5816_v34, %v1967_v19  ;;  %v4632_v62 = vpop.f32.mrb[47].mxu0  ;;  %v4638_v3 = vpop.f32.mrb[47].mxu1 }
 0x174   : > { %3088 = vst.msk [vmem:[%s5867_s15 + $0x68] sm:$0xff] %vm726_vm2, %v3056_v20  ;;  %3090 = vst.msk [vmem:[%s5867_s15 + $0x78] sm:$0xff] %vm726_vm2, %v3058_v59 }
 0x177   : > { %v2016_v27 = vpop.f32.mrb[48].mxu0  ;;  %v2068_v28 = vpop.f32.mrb[48].mxu1 }
 0x178   : > { %v3059_v4 = vsub.f32 %v5828_v40, %v2016_v27  ;;  %v3061_v9 = vsub.f32 %v5830_v42, %v2068_v28  ;;  %v4643_v10 = vpop.f32.mrb[49].mxu0  ;;  %v4649_v15 = vpop.f32.mrb[49].mxu1 }
 0x179   : > { %v2019_v51 = vpop.f32.mrb[50].mxu0  ;;  %v2071_v33 = vpop.f32.mrb[50].mxu1 }
 0x17a   : > { %3091 = vst.msk [vmem:[%s5867_s15 + $0x80] sm:$0xff] %vm726_vm2, %v3059_v4  ;;  %3093 = vst.msk [vmem:[%s5867_s15 + $0x90] sm:$0xff] %vm726_vm2, %v3061_v9  ;;  %v3060_v34 = vsub.f32 %v5832_v47, %v2019_v51  ;;  %v3062_v52 = vsub.f32 %v5834_v49, %v2071_v33  ;;  %v4644_v16 = vpop.f32.mrb[51].mxu0  ;;  %v4650_v21 = vpop.f32.mrb[51].mxu1 }
 0x17c   : > { %3092 = vst.msk [vmem:[%s5867_s15 + $0x88] sm:$0xff] %vm726_vm2, %v3060_v34  ;;  %3094 = vst.msk [vmem:[%s5867_s15 + $0x98] sm:$0xff] %vm726_vm2, %v3062_v52 }
 0x17f   : > { %v2120_v40 = vpop.f32.mrb[52].mxu0  ;;  %v2172_v42 = vpop.f32.mrb[52].mxu1 }
 0x180   : > { %v3063_v22 = vsub.f32 %v5840_v7, %v2120_v40  ;;  %v3065_v29 = vsub.f32 %v5842_v48, %v2172_v42  ;;  %v4655_v30 = vpop.f32.mrb[53].mxu0  ;;  %v4661_v38 = vpop.f32.mrb[53].mxu1 }
 0x181   : > { %v2123_v39 = vpop.f32.mrb[54].mxu0  ;;  %v2175_v47 = vpop.f32.mrb[54].mxu1 }
 0x182   : > { %3095 = vst.msk [vmem:[%s5867_s15 + $0xa0] sm:$0xff] %vm726_vm2, %v3063_v22  ;;  %3097 = vst.msk [vmem:[%s5867_s15 + $0xb0] sm:$0xff] %vm726_vm2, %v3065_v29  ;;  %v3064_v49 = vsub.f32 %v5844_v23, %v2123_v39  ;;  %v3066_v45 = vsub.f32 %v5846_v24, %v2175_v47  ;;  %v4656_v46 = vpop.f32.mrb[55].mxu0  ;;  %v4662_v57 = vpop.f32.mrb[55].mxu1 }
 0x184   : > { %3096 = vst.msk [vmem:[%s5867_s15 + $0xa8] sm:$0xff] %vm726_vm2, %v3064_v49  ;;  %3098 = vst.msk [vmem:[%s5867_s15 + $0xb8] sm:$0xff] %vm726_vm2, %v3066_v45 }
 0x187   : > { %v2224_v7 = vpop.f32.mrb[56].mxu0  ;;  %v2276_v48 = vpop.f32.mrb[56].mxu1 }
 0x188   : > { %v3067_v58 = vsub.f32 %v5848_v31, %v2224_v7  ;;  %v3069_v2 = vsub.f32 %v5850_v32, %v2276_v48  ;;  %v4667_v56 = vpop.f32.mrb[57].mxu0  ;;  %v4673_v60 = vpop.f32.mrb[57].mxu1 }
 0x189   : > { %v2227_v63 = vpop.f32.mrb[58].mxu0  ;;  %v2279_v23 = vpop.f32.mrb[58].mxu1 }
 0x18a   : > { %3099 = vst.msk [vmem:[%s5867_s15 + $0xc0] sm:$0xff] %vm726_vm2, %v3067_v58  ;;  %3101 = vst.msk [vmem:[%s5867_s15 + $0xd0] sm:$0xff] %vm726_vm2, %v3069_v2  ;;  %v3068_v24 = vsub.f32 %v5852_v36, %v2227_v63  ;;  %v3070_v0 = vsub.f32 %v5854_v37, %v2279_v23  ;;  %v4668_v8 = vpop.f32.mrb[59].mxu0  ;;  %v4674_v13 = vpop.f32.mrb[59].mxu1 }
 0x18c   : > { %3100 = vst.msk [vmem:[%s5867_s15 + $0xc8] sm:$0xff] %vm726_vm2, %v3068_v24  ;;  %3102 = vst.msk [vmem:[%s5867_s15 + $0xd8] sm:$0xff] %vm726_vm2, %v3070_v0 }
 0x18f   : > { %v2328_v31 = vpop.f32.mrb[60].mxu0  ;;  %v2380_v32 = vpop.f32.mrb[60].mxu1 }
 0x190   : > { %v3071_v25 = vsub.f32 %v5856_v44, %v2328_v31  ;;  %v3073_v26 = vsub.f32 %v5858_v50, %v2380_v32  ;;  %v4679_v18 = vpop.f32.mrb[61].mxu0  ;;  %v4685_v36 = vpop.f32.mrb[61].mxu1 }
 0x191   : > { %v2331_v5 = vpop.f32.mrb[62].mxu0  ;;  %v2383_v37 = vpop.f32.mrb[62].mxu1 }
 0x192   : > { %3103 = vst.msk [vmem:[%s5867_s15 + $0xe0] sm:$0xff] %vm726_vm2, %v3071_v25  ;;  %3105 = vst.msk [vmem:[%s5867_s15 + $0xf0] sm:$0xff] %vm726_vm2, %v3073_v26  ;;  %v3072_v6 = vsub.f32 %v5860_v1, %v2331_v5  ;;  %v3074_v35 = vsub.f32 %v5862_v14, %v2383_v37  ;;  %v4680_v41 = vpop.f32.mrb[63].mxu0  ;;  %v4686_v44 = vpop.f32.mrb[63].mxu1 }
 0x194   : > { %3104 = vst.msk [vmem:[%s5867_s15 + $0xe8] sm:$0xff] %vm726_vm2, %v3072_v6  ;;  %3106 = vst.msk [vmem:[%s5867_s15 + $0xf8] sm:$0xff] %vm726_vm2, %v3074_v35 }
 0x1d7   : > { %v3141_v50 = vpop.f32.mrb[64].mxu0  ;;  %v3182_v43 = vpop.f32.mrb[64].mxu1 }
 0x1d8   : > { %4324 = vst.msk [vmem:[%s5867_s15 + $0x100] sm:$0xff] %vm726_vm2, %v3141_v50  ;;  %4326 = vst.msk [vmem:[%s5867_s15 + $0x110] sm:$0xff] %vm726_vm2, %v3182_v43  ;;  %v4787_v11 = vpop.f32.mrb[65].mxu0  ;;  %v4793_v12 = vpop.f32.mrb[65].mxu1  ;;  %v3960_v50 = vld [vmem:[%s5867_s15] sm:$0xff] (%p5076_p5)  ;;  %v3962_v43 = vld [vmem:[%s5867_s15 + $0x8] sm:$0xff] (%p5076_p5) }
 0x1d9   : > { %v3144_v1 = vpop.f32.mrb[66].mxu0  ;;  %v3185_v14 = vpop.f32.mrb[66].mxu1  ;;  %v3964_v11 = vld [vmem:[%s5867_s15 + $0x10] sm:$0xff] (%p5076_p5)  ;;  %v3966_v12 = vld [vmem:[%s5867_s15 + $0x18] sm:$0xff] (%p5076_p5)  ;;  %3961 = vst [vmem:[%s6037_s18] sm:$0xff] (%p5076_p5), %v3960_v50  ;;  %3963 = vst [vmem:[%s6037_s18 + $0x8] sm:$0xff] (%p5076_p5), %v3962_v43 }
 0x1da   : > { %4325 = vst.msk [vmem:[%s5867_s15 + $0x108] sm:$0xff] %vm726_vm2, %v3144_v1  ;;  %4327 = vst.msk [vmem:[%s5867_s15 + $0x118] sm:$0xff] %vm726_vm2, %v3185_v14  ;;  %v4788_v55 = vpop.f32.mrb[67].mxu0  ;;  %v4794_v61 = vpop.f32.mrb[67].mxu1  ;;  %v3968_v1 = vld [vmem:[%s5867_s15 + $0x20] sm:$0xff] (%p5076_p5)  ;;  %v3970_v14 = vld [vmem:[%s5867_s15 + $0x28] sm:$0xff] (%p5076_p5) }
 0x1db   : > { %3965 = vst [vmem:[%s6037_s18 + $0x10] sm:$0xff] (%p5076_p5), %v3964_v11  ;;  %3967 = vst [vmem:[%s6037_s18 + $0x18] sm:$0xff] (%p5076_p5), %v3966_v12  ;;  %v3972_v55 = vld [vmem:[%s5867_s15 + $0x30] sm:$0xff] (%p5076_p5)  ;;  %v3974_v61 = vld [vmem:[%s5867_s15 + $0x38] sm:$0xff] (%p5076_p5) }
 0x1dc   : > { %3969 = vst [vmem:[%s6037_s18 + $0x20] sm:$0xff] (%p5076_p5), %v3968_v1  ;;  %3971 = vst [vmem:[%s6037_s18 + $0x28] sm:$0xff] (%p5076_p5), %v3970_v14 }
 0x1dd   : > { %3973 = vst [vmem:[%s6037_s18 + $0x30] sm:$0xff] (%p5076_p5), %v3972_v55  ;;  %3975 = vst [vmem:[%s6037_s18 + $0x38] sm:$0xff] (%p5076_p5), %v3974_v61 }
 0x1df   : > { %v3223_v17 = vpop.f32.mrb[68].mxu0  ;;  %v3264_v53 = vpop.f32.mrb[68].mxu1 }
 0x1e0   : > { %4328 = vst.msk [vmem:[%s5867_s15 + $0x120] sm:$0xff] %vm726_vm2, %v3223_v17  ;;  %4330 = vst.msk [vmem:[%s5867_s15 + $0x130] sm:$0xff] %vm726_vm2, %v3264_v53  ;;  %v4799_v54 = vpop.f32.mrb[69].mxu0  ;;  %v4805_v19 = vpop.f32.mrb[69].mxu1  ;;  %v3976_v17 = vld [vmem:[%s5867_s15 + $0x40] sm:$0xff] (%p5076_p5)  ;;  %v3978_v53 = vld [vmem:[%s5867_s15 + $0x48] sm:$0xff] (%p5076_p5) }
 0x1e1   : > { %v3226_v20 = vpop.f32.mrb[70].mxu0  ;;  %v3267_v59 = vpop.f32.mrb[70].mxu1  ;;  %3977 = vst [vmem:[%s6037_s18 + $0x40] sm:$0xff] (%p5076_p5), %v3976_v17  ;;  %v3980_v54 = vld [vmem:[%s5867_s15 + $0x50] sm:$0xff] (%p5076_p5)  ;;  %v3982_v19 = vld [vmem:[%s5867_s15 + $0x58] sm:$0xff] (%p5076_p5)  ;;  %3979 = vst [vmem:[%s6037_s18 + $0x48] sm:$0xff] (%p5076_p5), %v3978_v53 }
 0x1e2   : > { %4329 = vst.msk [vmem:[%s5867_s15 + $0x128] sm:$0xff] %vm726_vm2, %v3226_v20  ;;  %4331 = vst.msk [vmem:[%s5867_s15 + $0x138] sm:$0xff] %vm726_vm2, %v3267_v59  ;;  %v4800_v62 = vpop.f32.mrb[71].mxu0  ;;  %v4806_v3 = vpop.f32.mrb[71].mxu1  ;;  %v3984_v20 = vld [vmem:[%s5867_s15 + $0x60] sm:$0xff] (%p5076_p5)  ;;  %v3986_v59 = vld [vmem:[%s5867_s15 + $0x68] sm:$0xff] (%p5076_p5) }
 0x1e3   : > { %3981 = vst [vmem:[%s6037_s18 + $0x50] sm:$0xff] (%p5076_p5), %v3980_v54  ;;  %3983 = vst [vmem:[%s6037_s18 + $0x58] sm:$0xff] (%p5076_p5), %v3982_v19  ;;  %v3988_v62 = vld [vmem:[%s5867_s15 + $0x70] sm:$0xff] (%p5076_p5)  ;;  %v3990_v3 = vld [vmem:[%s5867_s15 + $0x78] sm:$0xff] (%p5076_p5) }
 0x1e4   : > { %3985 = vst [vmem:[%s6037_s18 + $0x60] sm:$0xff] (%p5076_p5), %v3984_v20  ;;  %3987 = vst [vmem:[%s6037_s18 + $0x68] sm:$0xff] (%p5076_p5), %v3986_v59 }
 0x1e5   : > { %3989 = vst [vmem:[%s6037_s18 + $0x70] sm:$0xff] (%p5076_p5), %v3988_v62  ;;  %3991 = vst [vmem:[%s6037_s18 + $0x78] sm:$0xff] (%p5076_p5), %v3990_v3 }
 0x1e7   : > { %v3305_v27 = vpop.f32.mrb[72].mxu0  ;;  %v3346_v28 = vpop.f32.mrb[72].mxu1 }
 0x1e8   : > { %4332 = vst.msk [vmem:[%s5867_s15 + $0x140] sm:$0xff] %vm726_vm2, %v3305_v27  ;;  %4334 = vst.msk [vmem:[%s5867_s15 + $0x150] sm:$0xff] %vm726_vm2, %v3346_v28  ;;  %v4811_v4 = vpop.f32.mrb[73].mxu0  ;;  %v4817_v9 = vpop.f32.mrb[73].mxu1  ;;  %v3992_v27 = vld [vmem:[%s5867_s15 + $0x80] sm:$0xff] (%p5076_p5)  ;;  %v3994_v28 = vld [vmem:[%s5867_s15 + $0x88] sm:$0xff] (%p5076_p5) }
 0x1e9   : > { %v3308_v10 = vpop.f32.mrb[74].mxu0  ;;  %v3349_v15 = vpop.f32.mrb[74].mxu1  ;;  %3993 = vst [vmem:[%s6037_s18 + $0x80] sm:$0xff] (%p5076_p5), %v3992_v27  ;;  %3995 = vst [vmem:[%s6037_s18 + $0x88] sm:$0xff] (%p5076_p5), %v3994_v28  ;;  %v3996_v4 = vld [vmem:[%s5867_s15 + $0x90] sm:$0xff] (%p5076_p5)  ;;  %v3998_v9 = vld [vmem:[%s5867_s15 + $0x98] sm:$0xff] (%p5076_p5) }
 0x1ea   : > { %4333 = vst.msk [vmem:[%s5867_s15 + $0x148] sm:$0xff] %vm726_vm2, %v3308_v10  ;;  %4335 = vst.msk [vmem:[%s5867_s15 + $0x158] sm:$0xff] %vm726_vm2, %v3349_v15  ;;  %v4812_v51 = vpop.f32.mrb[75].mxu0  ;;  %v4818_v33 = vpop.f32.mrb[75].mxu1  ;;  %v4000_v10 = vld [vmem:[%s5867_s15 + $0xa0] sm:$0xff] (%p5076_p5)  ;;  %v4002_v15 = vld [vmem:[%s5867_s15 + $0xa8] sm:$0xff] (%p5076_p5) }
 0x1eb   : > { %3997 = vst [vmem:[%s6037_s18 + $0x90] sm:$0xff] (%p5076_p5), %v3996_v4  ;;  %3999 = vst [vmem:[%s6037_s18 + $0x98] sm:$0xff] (%p5076_p5), %v3998_v9  ;;  %v4004_v51 = vld [vmem:[%s5867_s15 + $0xb0] sm:$0xff] (%p5076_p5)  ;;  %v4006_v33 = vld [vmem:[%s5867_s15 + $0xb8] sm:$0xff] (%p5076_p5) }
 0x1ec   : > { %4001 = vst [vmem:[%s6037_s18 + $0xa0] sm:$0xff] (%p5076_p5), %v4000_v10  ;;  %4003 = vst [vmem:[%s6037_s18 + $0xa8] sm:$0xff] (%p5076_p5), %v4002_v15 }
 0x1ed   : > { %4005 = vst [vmem:[%s6037_s18 + $0xb0] sm:$0xff] (%p5076_p5), %v4004_v51  ;;  %4007 = vst [vmem:[%s6037_s18 + $0xb8] sm:$0xff] (%p5076_p5), %v4006_v33 }
 0x1ef   : > { %v3387_v34 = vpop.f32.mrb[76].mxu0  ;;  %v3428_v52 = vpop.f32.mrb[76].mxu1 }
 0x1f0   : > { %4336 = vst.msk [vmem:[%s5867_s15 + $0x160] sm:$0xff] %vm726_vm2, %v3387_v34  ;;  %4338 = vst.msk [vmem:[%s5867_s15 + $0x170] sm:$0xff] %vm726_vm2, %v3428_v52  ;;  %v4823_v16 = vpop.f32.mrb[77].mxu0  ;;  %v4829_v21 = vpop.f32.mrb[77].mxu1  ;;  %v4008_v34 = vld [vmem:[%s5867_s15 + $0xc0] sm:$0xff] (%p5076_p5)  ;;  %v4010_v52 = vld [vmem:[%s5867_s15 + $0xc8] sm:$0xff] (%p5076_p5) }
 0x1f1   : > { %v3390_v40 = vpop.f32.mrb[78].mxu0  ;;  %v3431_v42 = vpop.f32.mrb[78].mxu1  ;;  %v4012_v16 = vld [vmem:[%s5867_s15 + $0xd0] sm:$0xff] (%p5076_p5)  ;;  %4009 = vst [vmem:[%s6037_s18 + $0xc0] sm:$0xff] (%p5076_p5), %v4008_v34  ;;  %4011 = vst [vmem:[%s6037_s18 + $0xc8] sm:$0xff] (%p5076_p5), %v4010_v52  ;;  %v4014_v21 = vld [vmem:[%s5867_s15 + $0xd8] sm:$0xff] (%p5076_p5) }
 0x1f2   : > { %4337 = vst.msk [vmem:[%s5867_s15 + $0x168] sm:$0xff] %vm726_vm2, %v3390_v40  ;;  %4339 = vst.msk [vmem:[%s5867_s15 + $0x178] sm:$0xff] %vm726_vm2, %v3431_v42  ;;  %v4824_v22 = vpop.f32.mrb[79].mxu0  ;;  %v4830_v29 = vpop.f32.mrb[79].mxu1  ;;  %v4016_v40 = vld [vmem:[%s5867_s15 + $0xe0] sm:$0xff] (%p5076_p5)  ;;  %v4018_v42 = vld [vmem:[%s5867_s15 + $0xe8] sm:$0xff] (%p5076_p5) }
 0x1f3   : > { %4013 = vst [vmem:[%s6037_s18 + $0xd0] sm:$0xff] (%p5076_p5), %v4012_v16  ;;  %4015 = vst [vmem:[%s6037_s18 + $0xd8] sm:$0xff] (%p5076_p5), %v4014_v21  ;;  %v4020_v22 = vld [vmem:[%s5867_s15 + $0xf0] sm:$0xff] (%p5076_p5)  ;;  %v4022_v29 = vld [vmem:[%s5867_s15 + $0xf8] sm:$0xff] (%p5076_p5) }
 0x1f4   : > { %4017 = vst [vmem:[%s6037_s18 + $0xe0] sm:$0xff] (%p5076_p5), %v4016_v40  ;;  %4019 = vst [vmem:[%s6037_s18 + $0xe8] sm:$0xff] (%p5076_p5), %v4018_v42 }
 0x1f5   : > { %4021 = vst [vmem:[%s6037_s18 + $0xf0] sm:$0xff] (%p5076_p5), %v4020_v22  ;;  %4023 = vst [vmem:[%s6037_s18 + $0xf8] sm:$0xff] (%p5076_p5), %v4022_v29 }
 0x1f7   : > { %v3469_v30 = vpop.f32.mrb[80].mxu0  ;;  %v3510_v38 = vpop.f32.mrb[80].mxu1 }
 0x1f8   : > { %4340 = vst.msk [vmem:[%s5867_s15 + $0x180] sm:$0xff] %vm726_vm2, %v3469_v30  ;;  %4342 = vst.msk [vmem:[%s5867_s15 + $0x190] sm:$0xff] %vm726_vm2, %v3510_v38  ;;  %v4835_v39 = vpop.f32.mrb[81].mxu0  ;;  %v4841_v47 = vpop.f32.mrb[81].mxu1  ;;  %v4024_v30 = vld [vmem:[%s5867_s15 + $0x100] sm:$0xff] (%p5076_p5)  ;;  %v4026_v38 = vld [vmem:[%s5867_s15 + $0x108] sm:$0xff] (%p5076_p5) }
 0x1f9   : > { %v3472_v49 = vpop.f32.mrb[82].mxu0  ;;  %v3513_v45 = vpop.f32.mrb[82].mxu1  ;;  %4025 = vst [vmem:[%s6037_s18 + $0x200] sm:$0xff] (%p5076_p5), %v4024_v30  ;;  %v4028_v39 = vld [vmem:[%s5867_s15 + $0x110] sm:$0xff] (%p5076_p5)  ;;  %v4030_v47 = vld [vmem:[%s5867_s15 + $0x118] sm:$0xff] (%p5076_p5)  ;;  %4027 = vst [vmem:[%s6037_s18 + $0x208] sm:$0xff] (%p5076_p5), %v4026_v38 }
 0x1fa   : > { %4341 = vst.msk [vmem:[%s5867_s15 + $0x188] sm:$0xff] %vm726_vm2, %v3472_v49  ;;  %4343 = vst.msk [vmem:[%s5867_s15 + $0x198] sm:$0xff] %vm726_vm2, %v3513_v45  ;;  %v4836_v46 = vpop.f32.mrb[83].mxu0  ;;  %v4842_v57 = vpop.f32.mrb[83].mxu1  ;;  %v4032_v49 = vld [vmem:[%s5867_s15 + $0x120] sm:$0xff] (%p5076_p5)  ;;  %v4034_v45 = vld [vmem:[%s5867_s15 + $0x128] sm:$0xff] (%p5076_p5) }
 0x1fb   : > { %4029 = vst [vmem:[%s6037_s18 + $0x210] sm:$0xff] (%p5076_p5), %v4028_v39  ;;  %4031 = vst [vmem:[%s6037_s18 + $0x218] sm:$0xff] (%p5076_p5), %v4030_v47  ;;  %v4036_v46 = vld [vmem:[%s5867_s15 + $0x130] sm:$0xff] (%p5076_p5)  ;;  %v4038_v57 = vld [vmem:[%s5867_s15 + $0x138] sm:$0xff] (%p5076_p5) }
 0x1fc   : > { %4033 = vst [vmem:[%s6037_s18 + $0x220] sm:$0xff] (%p5076_p5), %v4032_v49  ;;  %4035 = vst [vmem:[%s6037_s18 + $0x228] sm:$0xff] (%p5076_p5), %v4034_v45 }
 0x1fd   : > { %4037 = vst [vmem:[%s6037_s18 + $0x230] sm:$0xff] (%p5076_p5), %v4036_v46  ;;  %4039 = vst [vmem:[%s6037_s18 + $0x238] sm:$0xff] (%p5076_p5), %v4038_v57 }
 0x1ff   : > { %v3551_v7 = vpop.f32.mrb[84].mxu0  ;;  %v3592_v48 = vpop.f32.mrb[84].mxu1 }
 0x200   : > { %4344 = vst.msk [vmem:[%s5867_s15 + $0x1a0] sm:$0xff] %vm726_vm2, %v3551_v7  ;;  %4346 = vst.msk [vmem:[%s5867_s15 + $0x1b0] sm:$0xff] %vm726_vm2, %v3592_v48  ;;  %v4847_v58 = vpop.f32.mrb[85].mxu0  ;;  %v4853_v2 = vpop.f32.mrb[85].mxu1  ;;  %v4040_v7 = vld [vmem:[%s5867_s15 + $0x140] sm:$0xff] (%p5076_p5)  ;;  %v4042_v48 = vld [vmem:[%s5867_s15 + $0x148] sm:$0xff] (%p5076_p5) }
 0x201   : > { %v3554_v56 = vpop.f32.mrb[86].mxu0  ;;  %v3595_v60 = vpop.f32.mrb[86].mxu1  ;;  %4041 = vst [vmem:[%s6037_s18 + $0x240] sm:$0xff] (%p5076_p5), %v4040_v7  ;;  %4043 = vst [vmem:[%s6037_s18 + $0x248] sm:$0xff] (%p5076_p5), %v4042_v48  ;;  %v4044_v58 = vld [vmem:[%s5867_s15 + $0x150] sm:$0xff] (%p5076_p5)  ;;  %v4046_v2 = vld [vmem:[%s5867_s15 + $0x158] sm:$0xff] (%p5076_p5) }
 0x202   : > { %4345 = vst.msk [vmem:[%s5867_s15 + $0x1a8] sm:$0xff] %vm726_vm2, %v3554_v56  ;;  %4347 = vst.msk [vmem:[%s5867_s15 + $0x1b8] sm:$0xff] %vm726_vm2, %v3595_v60  ;;  %v4848_v63 = vpop.f32.mrb[87].mxu0  ;;  %v4854_v23 = vpop.f32.mrb[87].mxu1  ;;  %v4048_v56 = vld [vmem:[%s5867_s15 + $0x160] sm:$0xff] (%p5076_p5)  ;;  %v4050_v60 = vld [vmem:[%s5867_s15 + $0x168] sm:$0xff] (%p5076_p5) }
 0x203   : > { %4045 = vst [vmem:[%s6037_s18 + $0x250] sm:$0xff] (%p5076_p5), %v4044_v58  ;;  %4047 = vst [vmem:[%s6037_s18 + $0x258] sm:$0xff] (%p5076_p5), %v4046_v2  ;;  %v4052_v63 = vld [vmem:[%s5867_s15 + $0x170] sm:$0xff] (%p5076_p5)  ;;  %v4054_v23 = vld [vmem:[%s5867_s15 + $0x178] sm:$0xff] (%p5076_p5) }
 0x204   : > { %4049 = vst [vmem:[%s6037_s18 + $0x260] sm:$0xff] (%p5076_p5), %v4048_v56  ;;  %4051 = vst [vmem:[%s6037_s18 + $0x268] sm:$0xff] (%p5076_p5), %v4050_v60 }
 0x205   : > { %4053 = vst [vmem:[%s6037_s18 + $0x270] sm:$0xff] (%p5076_p5), %v4052_v63  ;;  %4055 = vst [vmem:[%s6037_s18 + $0x278] sm:$0xff] (%p5076_p5), %v4054_v23 }
 0x207   : > { %v3633_v24 = vpop.f32.mrb[88].mxu0  ;;  %v3674_v0 = vpop.f32.mrb[88].mxu1 }
 0x208   : > { %4348 = vst.msk [vmem:[%s5867_s15 + $0x1c0] sm:$0xff] %vm726_vm2, %v3633_v24  ;;  %4350 = vst.msk [vmem:[%s5867_s15 + $0x1d0] sm:$0xff] %vm726_vm2, %v3674_v0  ;;  %v4859_v8 = vpop.f32.mrb[89].mxu0  ;;  %v4865_v13 = vpop.f32.mrb[89].mxu1  ;;  %v4056_v24 = vld [vmem:[%s5867_s15 + $0x180] sm:$0xff] (%p5076_p5)  ;;  %v4058_v0 = vld [vmem:[%s5867_s15 + $0x188] sm:$0xff] (%p5076_p5) }
 0x209   : > { %v3636_v31 = vpop.f32.mrb[90].mxu0  ;;  %v3677_v32 = vpop.f32.mrb[90].mxu1  ;;  %v4060_v8 = vld [vmem:[%s5867_s15 + $0x190] sm:$0xff] (%p5076_p5)  ;;  %4057 = vst [vmem:[%s6037_s18 + $0x280] sm:$0xff] (%p5076_p5), %v4056_v24  ;;  %4059 = vst [vmem:[%s6037_s18 + $0x288] sm:$0xff] (%p5076_p5), %v4058_v0  ;;  %v4062_v13 = vld [vmem:[%s5867_s15 + $0x198] sm:$0xff] (%p5076_p5) }
 0x20a   : > { %4349 = vst.msk [vmem:[%s5867_s15 + $0x1c8] sm:$0xff] %vm726_vm2, %v3636_v31  ;;  %4351 = vst.msk [vmem:[%s5867_s15 + $0x1d8] sm:$0xff] %vm726_vm2, %v3677_v32  ;;  %v4860_v25 = vpop.f32.mrb[91].mxu0  ;;  %v4866_v26 = vpop.f32.mrb[91].mxu1  ;;  %v4064_v31 = vld [vmem:[%s5867_s15 + $0x1a0] sm:$0xff] (%p5076_p5)  ;;  %v4066_v32 = vld [vmem:[%s5867_s15 + $0x1a8] sm:$0xff] (%p5076_p5) }
 0x20b   : > { %4061 = vst [vmem:[%s6037_s18 + $0x290] sm:$0xff] (%p5076_p5), %v4060_v8  ;;  %4063 = vst [vmem:[%s6037_s18 + $0x298] sm:$0xff] (%p5076_p5), %v4062_v13  ;;  %v4068_v25 = vld [vmem:[%s5867_s15 + $0x1b0] sm:$0xff] (%p5076_p5)  ;;  %v4070_v26 = vld [vmem:[%s5867_s15 + $0x1b8] sm:$0xff] (%p5076_p5) }
 0x20c   : > { %3802 = sbr.rel (!%p5076_p5) target bundleno = 539 (0x21b), region = 114  ;;  %4065 = vst [vmem:[%s6037_s18 + $0x2a0] sm:$0xff] (%p5076_p5), %v4064_v31  ;;  %4067 = vst [vmem:[%s6037_s18 + $0x2a8] sm:$0xff] (%p5076_p5), %v4066_v32 }
 0x20d   : > { %4069 = vst [vmem:[%s6037_s18 + $0x2b0] sm:$0xff] (%p5076_p5), %v4068_v25  ;;  %4071 = vst [vmem:[%s6037_s18 + $0x2b8] sm:$0xff] (%p5076_p5), %v4070_v26 }
 0x20f   : > { %v3715_v18 = vpop.f32.mrb[92].mxu0  ;;  %v3756_v36 = vpop.f32.mrb[92].mxu1 }
 0x210   : > { %4352 = vst.msk [vmem:[%s5867_s15 + $0x1e0] sm:$0xff] %vm726_vm2, %v3715_v18  ;;  %4354 = vst.msk [vmem:[%s5867_s15 + $0x1f0] sm:$0xff] %vm726_vm2, %v3756_v36  ;;  %v4871_v5 = vpop.f32.mrb[93].mxu0  ;;  %v4877_v37 = vpop.f32.mrb[93].mxu1  ;;  %v4072_v18 = vld [vmem:[%s5867_s15 + $0x1c0] sm:$0xff] (%p5076_p5) }
 0x211   : > { %v3718_v6 = vpop.f32.mrb[94].mxu0  ;;  %v3759_v35 = vpop.f32.mrb[94].mxu1  ;;  %4073 = vst [vmem:[%s6037_s18 + $0x2c0] sm:$0xff] (%p5076_p5), %v4072_v18  ;;  %v4074_v36 = vld [vmem:[%s5867_s15 + $0x1c8] sm:$0xff] (%p5076_p5)  ;;  %v4076_v5 = vld [vmem:[%s5867_s15 + $0x1d0] sm:$0xff] (%p5076_p5)  ;;  %v4078_v37 = vld [vmem:[%s5867_s15 + $0x1d8] sm:$0xff] (%p5076_p5) }
 0x212   : > { %4353 = vst.msk [vmem:[%s5867_s15 + $0x1e8] sm:$0xff] %vm726_vm2, %v3718_v6  ;;  %4355 = vst.msk [vmem:[%s5867_s15 + $0x1f8] sm:$0xff] %vm726_vm2, %v3759_v35  ;;  %v4872_v41 = vpop.f32.mrb[95].mxu0  ;;  %v4878_v44 = vpop.f32.mrb[95].mxu1 }
 0x213   : > { %4075 = vst [vmem:[%s6037_s18 + $0x2c8] sm:$0xff] %v4074_v36  ;;  %4077 = vst [vmem:[%s6037_s18 + $0x2d0] sm:$0xff] %v4076_v5 }
 0x214   : > { %4079 = vst [vmem:[%s6037_s18 + $0x2d8] sm:$0xff] %v4078_v37 }
 0x217   : > { %v4080_v6 = vld [vmem:[%s5867_s15 + $0x1e0] sm:$0xff]  ;;  %v4084_v41 = vld [vmem:[%s5867_s15 + $0x1f0] sm:$0xff] }
 0x218   : > { %4081 = vst [vmem:[%s6037_s18 + $0x2e0] sm:$0xff] %v4080_v6  ;;  %4085 = vst [vmem:[%s6037_s18 + $0x2f0] sm:$0xff] %v4084_v41 }
 0x219   : > { %v4082_v35 = vld [vmem:[%s5867_s15 + $0x1e8] sm:$0xff]  ;;  %v4086_v44 = vld [vmem:[%s5867_s15 + $0x1f8] sm:$0xff] }
 0x21a   : > { %4083 = vst [vmem:[%s6037_s18 + $0x2e8] sm:$0xff] %v4082_v35  ;;  %4087 = vst [vmem:[%s6037_s18 + $0x2f8] sm:$0xff] %v4086_v44 }
 0x21b PF: > { %p9_p10 = scmp.ge.s32.totalorder %s5059_s13, 4   ;;  %s6182_s9 = smov %s5019_s10 }
 0x21c   : > { %s6183_s10 = smov %s5070_s16  ;;  %s6184_s11 = smov %s5059_s13 }
 0x21d   :  { %11 = sbr.rel (!%p9_p10) target bundleno = 2 (0x2), region = 194 }

</bundles_post_ra>
